<compile_context>
chip_gen: v7x
topology: tpu7x:2x2x1
jax: 0.10.0
libtpu: 0.0.40
codegen_flags: <defaults>
</compile_context>

<pallas_src>
import jax
import jax.numpy as jnp
from jax import lax
from jax.experimental import pallas as pl
from jax.experimental.pallas import tpu as pltpu

EPS = 1e-5  # PyTorch nn.LayerNorm default eps


# ---------------------------------------------------------------------------
# In-kernel math helpers (operate on values, not refs)
# ---------------------------------------------------------------------------
def _layernorm(x, gamma, beta):
    mu = jnp.mean(x, axis=-1, keepdims=True)
    xc = x - mu
    var = jnp.mean(xc * xc, axis=-1, keepdims=True)
    return xc * lax.rsqrt(var + EPS) * gamma + beta


def _gelu_exact(x):
    # PyTorch nn.GELU() default: exact erf-based GELU (kept exact to match
    # the reference; tanh-approx would move work to the idle EUP slot).
    return 0.5 * x * (1.0 + lax.erf(x * (1.0 / jnp.sqrt(2.0).astype(x.dtype))))


# ---------------------------------------------------------------------------
# Single fused kernel for the whole forward pass
# ---------------------------------------------------------------------------
def _fused_synergy_kernel(*refs):
    (alpha_ref,                                   # SMEM (1,1): raw exclusion_strength
     pt_ref, vw_ref, tx_ref,                      # raw modality features
     zp_ref, zv_ref, zt_ref,                      # unique PID components
     zpv_ref, zpt_ref, ztv_ref, zr_ref,           # pairwise + redundant components
     *rest) = refs
    out_ref = rest[-1]
    w_it = iter(rest[:-1])

    def take(n):
        return [next(w_it) for _ in range(n)]

    def vec3(ref):
        # (bias, gamma, beta) packed as rows 0/1/2 of a [3, D] array.
        return ref[0:1, :], ref[1:2, :], ref[2:3, :]

    def act(ref):
        return ref[...].astype(jnp.float32)

    def proj(x, w_ref, v_ref):
        # LayerNorm(x @ W + b)
        b, g, bt = vec3(v_ref)
        y = jnp.dot(x, w_ref[...], preferred_element_type=jnp.float32) + b
        return _layernorm(y, g, bt)

    def mlp3(a, b_, c, w1s_ref, v1_ref, w2_ref, v2_ref):
        # LN2(GELU(LN1([a|b|c] @ W1 + b1)) @ W2 + b2), W1 pre-split along K
        b1, g1, bt1 = vec3(v1_ref)
        b2, g2, bt2 = vec3(v2_ref)
        h = (jnp.dot(a, w1s_ref[0], preferred_element_type=jnp.float32)
             + jnp.dot(b_, w1s_ref[1], preferred_element_type=jnp.float32)
             + jnp.dot(c, w1s_ref[2], preferred_element_type=jnp.float32)
             + b1)
        h = _gelu_exact(_layernorm(h, g1, bt1))
        y = jnp.dot(h, w2_ref[...], preferred_element_type=jnp.float32) + b2
        return _layernorm(y, g2, bt2)

    def mlp1(x, w1_ref, v1_ref, w2_ref, v2_ref):
        b1, g1, bt1 = vec3(v1_ref)
        b2, g2, bt2 = vec3(v2_ref)
        h = jnp.dot(x, w1_ref[...], preferred_element_type=jnp.float32) + b1
        h = _gelu_exact(_layernorm(h, g1, bt1))
        y = jnp.dot(h, w2_ref[...], preferred_element_type=jnp.float32) + b2
        return _layernorm(y, g2, bt2)

    # unpack weights in the order produced by _flatten_params
    p_proj = take(2)
    v_proj = take(2)
    t_proj = take(2)
    tri_w = take(4)
    uniq_w = take(4)
    pair_w = take(4)
    comb_w = take(4)
    red_w = take(4)
    amp_w = take(4)

    # modality projections (kept in vregs — never written to HBM)
    p = proj(act(pt_ref), *p_proj)
    v = proj(act(vw_ref), *v_proj)
    t = proj(act(tx_ref), *t_proj)

    # trimodal detector and lower-order influence paths (split-K, no concat)
    all_trimodal = mlp3(p, v, t, *tri_w)
    unique_influence = mlp3(act(zp_ref), act(zv_ref), act(zt_ref), *uniq_w)
    pairwise_influence = mlp3(act(zpv_ref), act(zpt_ref), act(ztv_ref), *pair_w)
    redundancy_influence = mlp1(act(zr_ref), *red_w)
    total_lower_order = mlp3(unique_influence, pairwise_influence,
                             redundancy_influence, *comb_w)

    # scalar sigmoid of the learned exclusion strength: one (1,1) exp,
    # broadcast only at the final multiply (no tile-wide transcendental).
    s = alpha_ref[0, 0]
    sig = 1.0 / (1.0 + jnp.exp(jnp.full((1, 1), -s, dtype=jnp.float32)))
    excluded = all_trimodal - sig * total_lower_order

    out_ref[...] = mlp1(excluded, *amp_w).astype(out_ref.dtype)


# ---------------------------------------------------------------------------
# Deterministic parameter initialization (synthetic weights)
# ---------------------------------------------------------------------------
def _init_linear_ln(key, d_in, d_out):
    kw, kb = jax.random.split(key)
    w = jax.random.normal(kw, (d_in, d_out), jnp.float32) * 0.05
    b = jax.random.normal(kb, (1, d_out), jnp.float32) * 0.01
    g = jnp.ones((1, d_out), jnp.float32)
    bt = jnp.zeros((1, d_out), jnp.float32)
    return (w, b, g, bt)


def _init_mlp(key, d_in, d_hidden, d_out):
    k1, k2 = jax.random.split(key)
    w1, b1, g1, bt1 = _init_linear_ln(k1, d_in, d_hidden)
    w2, b2, g2, bt2 = _init_linear_ln(k2, d_hidden, d_out)
    return (w1, b1, g1, bt1, w2, b2, g2, bt2)


def init_params(key, point_dim, view_dim, text_dim, fusion_dim, hidden_dim):
    del hidden_dim  # unused in the forward pass (mirrors the PyTorch module)
    keys = jax.random.split(key, 10)
    f3h = fusion_dim * 3 // 16  # matches nn.Linear(fusion_dim*3, fusion_dim*3//16)
    return {
        "point_proj": _init_linear_ln(keys[0], point_dim, fusion_dim),
        "view_proj": _init_linear_ln(keys[1], view_dim, fusion_dim),
        "text_proj": _init_linear_ln(keys[2], text_dim, fusion_dim),
        "trimodal": _init_mlp(keys[3], fusion_dim * 3, f3h, fusion_dim),
        "unique_remover": _init_mlp(keys[4], fusion_dim * 3, f3h, fusion_dim),
        "pairwise_remover": _init_mlp(keys[5], fusion_dim * 3, f3h, fusion_dim),
        "redundancy_remover": _init_mlp(keys[6], fusion_dim, fusion_dim // 2, fusion_dim),
        "exclusion_combiner": _init_mlp(keys[7], fusion_dim * 3, f3h, fusion_dim),
        "emergence_amplifier": _init_mlp(keys[8], fusion_dim, fusion_dim // 2, fusion_dim),
        "exclusion_strength": jnp.asarray(0.7, jnp.float32),
    }


def _pack_vec3(b, g, bt):
    # One [3, D] operand instead of three [1, D] operands.
    return jnp.concatenate([b, g, bt], axis=0)


def _flatten_params(params):
    """Flat, packed weight list in the order the fused kernel consumes it."""
    flat = []
    for name in ("point_proj", "view_proj", "text_proj"):
        w, b, g, bt = params[name]
        flat.extend((w, _pack_vec3(b, g, bt)))
    for name in ("trimodal", "unique_remover", "pairwise_remover",
                 "exclusion_combiner"):
        w1, b1, g1, bt1, w2, b2, g2, bt2 = params[name]
        f = w1.shape[0] // 3
        # split-K stack: [3, F, H] replaces the host-side concat of inputs
        w1s = jnp.stack([w1[:f], w1[f:2 * f], w1[2 * f:]], axis=0)
        flat.extend((w1s, _pack_vec3(b1, g1, bt1), w2, _pack_vec3(b2, g2, bt2)))
    for name in ("redundancy_remover", "emergence_amplifier"):
        w1, b1, g1, bt1, w2, b2, g2, bt2 = params[name]
        flat.extend((w1, _pack_vec3(b1, g1, bt1), w2, _pack_vec3(b2, g2, bt2)))
    return flat


def _round_up(x, m):
    return ((x + m - 1) // m) * m


def _const_spec(w):
    zeros = (0,) * w.ndim

    def idx(i):
        return zeros

    return pl.BlockSpec(w.shape, idx)


# ---------------------------------------------------------------------------
# Forward pass (mirrors TaskAwareHigherOrderSynergyDetector.forward)
# ---------------------------------------------------------------------------
def synergy_detector_forward(params, point_feat, view_feat, text_feat,
                             z_p_unique, z_v_unique, z_t_unique,
                             z_pv, z_pt, z_tv, z_redundant,
                             *, row_tile=2048, input_dtype=jnp.float32):
    B, N = point_feat.shape[0], point_feat.shape[1]
    M = B * N
    F = params["point_proj"][0].shape[1]

    flat = lambda t: t.reshape(M, t.shape[-1]).astype(input_dtype)
    acts = [flat(point_feat), flat(view_feat), flat(text_feat),
            flat(z_p_unique), flat(z_v_unique), flat(z_t_unique),
            flat(z_pv), flat(z_pt), flat(z_tv), flat(z_redundant)]
    weights = _flatten_params(params)
    alpha_raw = params["exclusion_strength"].reshape(1, 1).astype(jnp.float32)

    # ---- per-generation row-tile sizing (HBM-read-bound kernel) ----------
    act_bytes = sum(a.shape[1] * a.dtype.itemsize for a in acts)   # per row
    out_bytes = F * 4                                              # per row
    weight_bytes = sum(w.size * 4 for w in weights)
    per_row = 2 * act_bytes + 2 * out_bytes                        # double-buffered
    try:
        vmem_cap = pltpu.get_tpu_info().vmem_capacity_bytes        # 64 MiB on v7x
    except Exception:
        vmem_cap = 64 << 20                                        # conservative floor
    budget = max(8 << 20, int(vmem_cap * 0.4) - 2 * weight_bytes)

    row_align = 16 if jnp.dtype(input_dtype).itemsize < 4 else 8
    tm_max = max(row_align, (budget // per_row) // row_align * row_align)
    if M <= row_align:
        tm = M                                   # full-dim block (always legal)
    else:
        tm = min(row_tile, tm_max, _round_up(M, row_align))
        # >=2 grid steps so both v7x TensorCores get work via "parallel"
        tm = min(tm, _round_up(pl.cdiv(M, 2), row_align))
        tm = max(row_align, (tm // row_align) * row_align)
    grid = (pl.cdiv(M, tm),)

    tile_bytes = 2 * tm * act_bytes + 2 * tm * out_bytes + 2 * weight_bytes
    vmem_limit = int(min(vmem_cap * 3 // 4,
                         max(tile_bytes + (16 << 20), 32 << 20)))

    # ---- advisory cost estimate so XLA can overlap around the kernel -----
    Dp, Dv, Dt = (point_feat.shape[-1], view_feat.shape[-1], text_feat.shape[-1])
    H6 = params["trimodal"][0].shape[1]              # fusion_dim*3 // 16
    H2 = params["redundancy_remover"][0].shape[1]    # fusion_dim // 2
    flops_per_row = (2 * (Dp + Dv + Dt) * F
                     + 4 * 2 * (3 * F * H6 + H6 * F)
                     + 2 * 2 * (F * H2 + H2 * F))
    cost = pl.CostEstimate(
        flops=int(M * flops_per_row),
        transcendentals=int(M * (4 * H6 + 2 * H2 + 12)),
        bytes_accessed=int(M * (act_bytes + out_bytes) + weight_bytes))

    alpha_spec = pl.BlockSpec(memory_space=pltpu.MemorySpace.SMEM)
    act_specs = [pl.BlockSpec((tm, a.shape[1]), lambda i: (i, 0)) for a in acts]
    w_specs = [_const_spec(w) for w in weights]      # constant index_map -> no re-fetch
    out_spec = pl.BlockSpec((tm, F), lambda i: (i, 0))
    # Weights total ~35 KB at fusion_dim=32; double-buffering them is noise, so
    # no explicit single-buffering is requested.
    # TODO(synk): final HBM store is [M, F=32] (<128 lanes, masked vst); a
    # lane-dense (M,128) repack would quadruple write bytes for a ~10%-of-traffic
    # path — only worth it if xprof shows the store on the critical path.

    out = pl.pallas_call(
        _fused_synergy_kernel,
        out_shape=jax.ShapeDtypeStruct((M, F), jnp.float32),
        grid=grid,
        in_specs=[alpha_spec] + act_specs + w_specs,
        out_specs=out_spec,
        compiler_params=pltpu.CompilerParams(
            dimension_semantics=("parallel",),
            vmem_limit_bytes=vmem_limit),
        cost_estimate=cost,
    )(alpha_raw, *acts, *weights)

    return out.reshape(B, N, F)


# ---------------------------------------------------------------------------
# Main
# ---------------------------------------------------------------------------
if __name__ == "__main__":
    B, N = 2, 8
    point_dim, view_dim, text_dim = 48, 32, 24
    fusion_dim, hidden_dim = 32, 64

    key = jax.random.PRNGKey(0)
    k_param, *k_in = jax.random.split(key, 12)

    params = init_params(k_param, point_dim, view_dim, text_dim,
                         fusion_dim, hidden_dim)

    point_feat = jax.random.normal(k_in[0], (B, N, point_dim), jnp.float32)
    view_feat = jax.random.normal(k_in[1], (B, N, view_dim), jnp.float32)
    text_feat = jax.random.normal(k_in[2], (B, N, text_dim), jnp.float32)
    z_p_unique = jax.random.normal(k_in[3], (B, N, fusion_dim), jnp.float32)
    z_v_unique = jax.random.normal(k_in[4], (B, N, fusion_dim), jnp.float32)
    z_t_unique = jax.random.normal(k_in[5], (B, N, fusion_dim), jnp.float32)
    z_pv = jax.random.normal(k_in[6], (B, N, fusion_dim), jnp.float32)
    z_pt = jax.random.normal(k_in[7], (B, N, fusion_dim), jnp.float32)
    z_tv = jax.random.normal(k_in[8], (B, N, fusion_dim), jnp.float32)
    z_redundant = jax.random.normal(k_in[9], (B, N, fusion_dim), jnp.float32)

    fwd = jax.jit(synergy_detector_forward)
    out = fwd(params, point_feat, view_feat, text_feat,
              z_p_unique, z_v_unique, z_t_unique,
              z_pv, z_pt, z_tv, z_redundant)
    out = jax.block_until_ready(out)

    assert out.shape == (B, N, fusion_dim), out.shape
    assert jnp.all(jnp.isfinite(out))
    print("KERNEL_OK")
</pallas_src>

<mosaic_0001>
module attributes {stable_mosaic.version = 11 : i64} {
  func.func @_fused_synergy_kernel(%arg0: i32, %arg1: memref<1x1xf32, #tpu.memory_space<smem>>, %arg2: memref<8x48xf32, #tpu.memory_space<vmem>>, %arg3: memref<8x32xf32, #tpu.memory_space<vmem>>, %arg4: memref<8x24xf32, #tpu.memory_space<vmem>>, %arg5: memref<8x32xf32, #tpu.memory_space<vmem>>, %arg6: memref<8x32xf32, #tpu.memory_space<vmem>>, %arg7: memref<8x32xf32, #tpu.memory_space<vmem>>, %arg8: memref<8x32xf32, #tpu.memory_space<vmem>>, %arg9: memref<8x32xf32, #tpu.memory_space<vmem>>, %arg10: memref<8x32xf32, #tpu.memory_space<vmem>>, %arg11: memref<8x32xf32, #tpu.memory_space<vmem>>, %arg12: memref<48x32xf32, #tpu.memory_space<vmem>>, %arg13: memref<3x32xf32, #tpu.memory_space<vmem>>, %arg14: memref<32x32xf32, #tpu.memory_space<vmem>>, %arg15: memref<3x32xf32, #tpu.memory_space<vmem>>, %arg16: memref<24x32xf32, #tpu.memory_space<vmem>>, %arg17: memref<3x32xf32, #tpu.memory_space<vmem>>, %arg18: memref<3x32x6xf32, #tpu.memory_space<vmem>>, %arg19: memref<3x6xf32, #tpu.memory_space<vmem>>, %arg20: memref<6x32xf32, #tpu.memory_space<vmem>>, %arg21: memref<3x32xf32, #tpu.memory_space<vmem>>, %arg22: memref<3x32x6xf32, #tpu.memory_space<vmem>>, %arg23: memref<3x6xf32, #tpu.memory_space<vmem>>, %arg24: memref<6x32xf32, #tpu.memory_space<vmem>>, %arg25: memref<3x32xf32, #tpu.memory_space<vmem>>, %arg26: memref<3x32x6xf32, #tpu.memory_space<vmem>>, %arg27: memref<3x6xf32, #tpu.memory_space<vmem>>, %arg28: memref<6x32xf32, #tpu.memory_space<vmem>>, %arg29: memref<3x32xf32, #tpu.memory_space<vmem>>, %arg30: memref<3x32x6xf32, #tpu.memory_space<vmem>>, %arg31: memref<3x6xf32, #tpu.memory_space<vmem>>, %arg32: memref<6x32xf32, #tpu.memory_space<vmem>>, %arg33: memref<3x32xf32, #tpu.memory_space<vmem>>, %arg34: memref<32x16xf32, #tpu.memory_space<vmem>>, %arg35: memref<3x16xf32, #tpu.memory_space<vmem>>, %arg36: memref<16x32xf32, #tpu.memory_space<vmem>>, %arg37: memref<3x32xf32, #tpu.memory_space<vmem>>, %arg38: memref<32x16xf32, #tpu.memory_space<vmem>>, %arg39: memref<3x16xf32, #tpu.memory_space<vmem>>, %arg40: memref<16x32xf32, #tpu.memory_space<vmem>>, %arg41: memref<3x32xf32, #tpu.memory_space<vmem>>, %arg42: memref<8x32xf32, #tpu.memory_space<vmem>>) attributes {dimension_semantics = [#tpu.dimension_semantics<parallel>], iteration_bounds = array<i64: 2>, scalar_prefetch = 0 : i64, scratch_operands = 0 : i64, tpu.core_type = #tpu.core_type<tc>, window_params = [{transform_indices = @transform_0, window_bounds = array<i64: 1, 1>}, {transform_indices = @transform_1, window_bounds = array<i64: 8, 48>}, {transform_indices = @transform_2, window_bounds = array<i64: 8, 32>}, {transform_indices = @transform_3, window_bounds = array<i64: 8, 24>}, {transform_indices = @transform_4, window_bounds = array<i64: 8, 32>}, {transform_indices = @transform_5, window_bounds = array<i64: 8, 32>}, {transform_indices = @transform_6, window_bounds = array<i64: 8, 32>}, {transform_indices = @transform_7, window_bounds = array<i64: 8, 32>}, {transform_indices = @transform_8, window_bounds = array<i64: 8, 32>}, {transform_indices = @transform_9, window_bounds = array<i64: 8, 32>}, {transform_indices = @transform_10, window_bounds = array<i64: 8, 32>}, {pipeline_mode = #tpu.pipeline_mode<synchronous>, transform_indices = @transform_11, window_bounds = array<i64: 48, 32>}, {pipeline_mode = #tpu.pipeline_mode<synchronous>, transform_indices = @transform_12, window_bounds = array<i64: 3, 32>}, {pipeline_mode = #tpu.pipeline_mode<synchronous>, transform_indices = @transform_13, window_bounds = array<i64: 32, 32>}, {pipeline_mode = #tpu.pipeline_mode<synchronous>, transform_indices = @transform_14, window_bounds = array<i64: 3, 32>}, {pipeline_mode = #tpu.pipeline_mode<synchronous>, transform_indices = @transform_15, window_bounds = array<i64: 24, 32>}, {pipeline_mode = #tpu.pipeline_mode<synchronous>, transform_indices = @transform_16, window_bounds = array<i64: 3, 32>}, {pipeline_mode = #tpu.pipeline_mode<synchronous>, transform_indices = @transform_17, window_bounds = array<i64: 3, 32, 6>}, {pipeline_mode = #tpu.pipeline_mode<synchronous>, transform_indices = @transform_18, window_bounds = array<i64: 3, 6>}, {pipeline_mode = #tpu.pipeline_mode<synchronous>, transform_indices = @transform_19, window_bounds = array<i64: 6, 32>}, {pipeline_mode = #tpu.pipeline_mode<synchronous>, transform_indices = @transform_20, window_bounds = array<i64: 3, 32>}, {pipeline_mode = #tpu.pipeline_mode<synchronous>, transform_indices = @transform_21, window_bounds = array<i64: 3, 32, 6>}, {pipeline_mode = #tpu.pipeline_mode<synchronous>, transform_indices = @transform_22, window_bounds = array<i64: 3, 6>}, {pipeline_mode = #tpu.pipeline_mode<synchronous>, transform_indices = @transform_23, window_bounds = array<i64: 6, 32>}, {pipeline_mode = #tpu.pipeline_mode<synchronous>, transform_indices = @transform_24, window_bounds = array<i64: 3, 32>}, {pipeline_mode = #tpu.pipeline_mode<synchronous>, transform_indices = @transform_25, window_bounds = array<i64: 3, 32, 6>}, {pipeline_mode = #tpu.pipeline_mode<synchronous>, transform_indices = @transform_26, window_bounds = array<i64: 3, 6>}, {pipeline_mode = #tpu.pipeline_mode<synchronous>, transform_indices = @transform_27, window_bounds = array<i64: 6, 32>}, {pipeline_mode = #tpu.pipeline_mode<synchronous>, transform_indices = @transform_28, window_bounds = array<i64: 3, 32>}, {pipeline_mode = #tpu.pipeline_mode<synchronous>, transform_indices = @transform_29, window_bounds = array<i64: 3, 32, 6>}, {pipeline_mode = #tpu.pipeline_mode<synchronous>, transform_indices = @transform_30, window_bounds = array<i64: 3, 6>}, {pipeline_mode = #tpu.pipeline_mode<synchronous>, transform_indices = @transform_31, window_bounds = array<i64: 6, 32>}, {pipeline_mode = #tpu.pipeline_mode<synchronous>, transform_indices = @transform_32, window_bounds = array<i64: 3, 32>}, {pipeline_mode = #tpu.pipeline_mode<synchronous>, transform_indices = @transform_33, window_bounds = array<i64: 32, 16>}, {pipeline_mode = #tpu.pipeline_mode<synchronous>, transform_indices = @transform_34, window_bounds = array<i64: 3, 16>}, {pipeline_mode = #tpu.pipeline_mode<synchronous>, transform_indices = @transform_35, window_bounds = array<i64: 16, 32>}, {pipeline_mode = #tpu.pipeline_mode<synchronous>, transform_indices = @transform_36, window_bounds = array<i64: 3, 32>}, {pipeline_mode = #tpu.pipeline_mode<synchronous>, transform_indices = @transform_37, window_bounds = array<i64: 32, 16>}, {pipeline_mode = #tpu.pipeline_mode<synchronous>, transform_indices = @transform_38, window_bounds = array<i64: 3, 16>}, {pipeline_mode = #tpu.pipeline_mode<synchronous>, transform_indices = @transform_39, window_bounds = array<i64: 16, 32>}, {pipeline_mode = #tpu.pipeline_mode<synchronous>, transform_indices = @transform_40, window_bounds = array<i64: 3, 32>}, {transform_indices = @transform_41, window_bounds = array<i64: 8, 32>}]} {
    %c0 = arith.constant 0 : index
    %c0_0 = arith.constant 0 : index
    %0 = vector.load %arg2[%c0, %c0_0] : memref<8x48xf32, #tpu.memory_space<vmem>>, vector<8x48xf32>
    %c0_1 = arith.constant 0 : index
    %c0_2 = arith.constant 0 : index
    %1 = vector.load %arg13[%c0_1, %c0_2] : memref<3x32xf32, #tpu.memory_space<vmem>>, vector<1x32xf32>
    %c1 = arith.constant 1 : index
    %c0_3 = arith.constant 0 : index
    %2 = vector.load %arg13[%c1, %c0_3] : memref<3x32xf32, #tpu.memory_space<vmem>>, vector<1x32xf32>
    %c2 = arith.constant 2 : index
    %c0_4 = arith.constant 0 : index
    %3 = vector.load %arg13[%c2, %c0_4] : memref<3x32xf32, #tpu.memory_space<vmem>>, vector<1x32xf32>
    %c0_5 = arith.constant 0 : index
    %c0_6 = arith.constant 0 : index
    %4 = vector.load %arg12[%c0_5, %c0_6] : memref<48x32xf32, #tpu.memory_space<vmem>>, vector<48x32xf32>
    %cst = arith.constant dense<0.000000e+00> : vector<8x32xf32>
    %5 = tpu.matmul %0, %4, %cst {dimension_numbers = #tpu.dot_dimension_numbers<[1], [0], [0], [1], [0, 0, 1, 1], [], []>} : vector<8x48xf32>, vector<48x32xf32>, vector<8x32xf32> -> vector<8x32xf32>
    %6 = vector.broadcast %1 : vector<1x32xf32> to vector<8x32xf32>
    %7 = arith.addf %5, %6 : vector<8x32xf32>
    %cst_7 = arith.constant dense<0.000000e+00> : vector<8xf32>
    %8 = vector.multi_reduction <add>, %7, %cst_7 [1] : vector<8x32xf32> to vector<8xf32>
    %9 = vector.shape_cast %8 : vector<8xf32> to vector<8x1xf32>
    %cst_8 = arith.constant 3.200000e+01 : f32
    %10 = vector.broadcast %cst_8 : f32 to vector<8x1xf32>
    %11 = arith.divf %9, %10 : vector<8x1xf32>
    %12 = vector.broadcast %11 : vector<8x1xf32> to vector<8x32xf32>
    %13 = arith.subf %7, %12 : vector<8x32xf32>
    %14 = arith.mulf %13, %13 : vector<8x32xf32>
    %cst_9 = arith.constant dense<0.000000e+00> : vector<8xf32>
    %15 = vector.multi_reduction <add>, %14, %cst_9 [1] : vector<8x32xf32> to vector<8xf32>
    %16 = vector.shape_cast %15 : vector<8xf32> to vector<8x1xf32>
    %cst_10 = arith.constant 3.200000e+01 : f32
    %17 = vector.broadcast %cst_10 : f32 to vector<8x1xf32>
    %18 = arith.divf %16, %17 : vector<8x1xf32>
    %cst_11 = arith.constant 9.99999974E-6 : f32
    %19 = vector.broadcast %cst_11 : f32 to vector<8x1xf32>
    %20 = arith.addf %18, %19 : vector<8x1xf32>
    %21 = math.rsqrt %20 : vector<8x1xf32>
    %22 = vector.broadcast %21 : vector<8x1xf32> to vector<8x32xf32>
    %23 = arith.mulf %13, %22 : vector<8x32xf32>
    %24 = vector.broadcast %2 : vector<1x32xf32> to vector<8x32xf32>
    %25 = arith.mulf %23, %24 : vector<8x32xf32>
    %26 = vector.broadcast %3 : vector<1x32xf32> to vector<8x32xf32>
    %27 = arith.addf %25, %26 : vector<8x32xf32>
    %c0_12 = arith.constant 0 : index
    %c0_13 = arith.constant 0 : index
    %28 = vector.load %arg3[%c0_12, %c0_13] : memref<8x32xf32, #tpu.memory_space<vmem>>, vector<8x32xf32>
    %c0_14 = arith.constant 0 : index
    %c0_15 = arith.constant 0 : index
    %29 = vector.load %arg15[%c0_14, %c0_15] : memref<3x32xf32, #tpu.memory_space<vmem>>, vector<1x32xf32>
    %c1_16 = arith.constant 1 : index
    %c0_17 = arith.constant 0 : index
    %30 = vector.load %arg15[%c1_16, %c0_17] : memref<3x32xf32, #tpu.memory_space<vmem>>, vector<1x32xf32>
    %c2_18 = arith.constant 2 : index
    %c0_19 = arith.constant 0 : index
    %31 = vector.load %arg15[%c2_18, %c0_19] : memref<3x32xf32, #tpu.memory_space<vmem>>, vector<1x32xf32>
    %c0_20 = arith.constant 0 : index
    %c0_21 = arith.constant 0 : index
    %32 = vector.load %arg14[%c0_20, %c0_21] : memref<32x32xf32, #tpu.memory_space<vmem>>, vector<32x32xf32>
    %cst_22 = arith.constant dense<0.000000e+00> : vector<8x32xf32>
    %33 = tpu.matmul %28, %32, %cst_22 {dimension_numbers = #tpu.dot_dimension_numbers<[1], [0], [0], [1], [0, 0, 1, 1], [], []>} : vector<8x32xf32>, vector<32x32xf32>, vector<8x32xf32> -> vector<8x32xf32>
    %34 = vector.broadcast %29 : vector<1x32xf32> to vector<8x32xf32>
    %35 = arith.addf %33, %34 : vector<8x32xf32>
    %cst_23 = arith.constant dense<0.000000e+00> : vector<8xf32>
    %36 = vector.multi_reduction <add>, %35, %cst_23 [1] : vector<8x32xf32> to vector<8xf32>
    %37 = vector.shape_cast %36 : vector<8xf32> to vector<8x1xf32>
    %cst_24 = arith.constant 3.200000e+01 : f32
    %38 = vector.broadcast %cst_24 : f32 to vector<8x1xf32>
    %39 = arith.divf %37, %38 : vector<8x1xf32>
    %40 = vector.broadcast %39 : vector<8x1xf32> to vector<8x32xf32>
    %41 = arith.subf %35, %40 : vector<8x32xf32>
    %42 = arith.mulf %41, %41 : vector<8x32xf32>
    %cst_25 = arith.constant dense<0.000000e+00> : vector<8xf32>
    %43 = vector.multi_reduction <add>, %42, %cst_25 [1] : vector<8x32xf32> to vector<8xf32>
    %44 = vector.shape_cast %43 : vector<8xf32> to vector<8x1xf32>
    %cst_26 = arith.constant 3.200000e+01 : f32
    %45 = vector.broadcast %cst_26 : f32 to vector<8x1xf32>
    %46 = arith.divf %44, %45 : vector<8x1xf32>
    %cst_27 = arith.constant 9.99999974E-6 : f32
    %47 = vector.broadcast %cst_27 : f32 to vector<8x1xf32>
    %48 = arith.addf %46, %47 : vector<8x1xf32>
    %49 = math.rsqrt %48 : vector<8x1xf32>
    %50 = vector.broadcast %49 : vector<8x1xf32> to vector<8x32xf32>
    %51 = arith.mulf %41, %50 : vector<8x32xf32>
    %52 = vector.broadcast %30 : vector<1x32xf32> to vector<8x32xf32>
    %53 = arith.mulf %51, %52 : vector<8x32xf32>
    %54 = vector.broadcast %31 : vector<1x32xf32> to vector<8x32xf32>
    %55 = arith.addf %53, %54 : vector<8x32xf32>
    %c0_28 = arith.constant 0 : index
    %c0_29 = arith.constant 0 : index
    %56 = vector.load %arg4[%c0_28, %c0_29] : memref<8x24xf32, #tpu.memory_space<vmem>>, vector<8x24xf32>
    %c0_30 = arith.constant 0 : index
    %c0_31 = arith.constant 0 : index
    %57 = vector.load %arg17[%c0_30, %c0_31] : memref<3x32xf32, #tpu.memory_space<vmem>>, vector<1x32xf32>
    %c1_32 = arith.constant 1 : index
    %c0_33 = arith.constant 0 : index
    %58 = vector.load %arg17[%c1_32, %c0_33] : memref<3x32xf32, #tpu.memory_space<vmem>>, vector<1x32xf32>
    %c2_34 = arith.constant 2 : index
    %c0_35 = arith.constant 0 : index
    %59 = vector.load %arg17[%c2_34, %c0_35] : memref<3x32xf32, #tpu.memory_space<vmem>>, vector<1x32xf32>
    %c0_36 = arith.constant 0 : index
    %c0_37 = arith.constant 0 : index
    %60 = vector.load %arg16[%c0_36, %c0_37] : memref<24x32xf32, #tpu.memory_space<vmem>>, vector<24x32xf32>
    %cst_38 = arith.constant dense<0.000000e+00> : vector<8x32xf32>
    %61 = tpu.matmul %56, %60, %cst_38 {dimension_numbers = #tpu.dot_dimension_numbers<[1], [0], [0], [1], [0, 0, 1, 1], [], []>} : vector<8x24xf32>, vector<24x32xf32>, vector<8x32xf32> -> vector<8x32xf32>
    %62 = vector.broadcast %57 : vector<1x32xf32> to vector<8x32xf32>
    %63 = arith.addf %61, %62 : vector<8x32xf32>
    %cst_39 = arith.constant dense<0.000000e+00> : vector<8xf32>
    %64 = vector.multi_reduction <add>, %63, %cst_39 [1] : vector<8x32xf32> to vector<8xf32>
    %65 = vector.shape_cast %64 : vector<8xf32> to vector<8x1xf32>
    %cst_40 = arith.constant 3.200000e+01 : f32
    %66 = vector.broadcast %cst_40 : f32 to vector<8x1xf32>
    %67 = arith.divf %65, %66 : vector<8x1xf32>
    %68 = vector.broadcast %67 : vector<8x1xf32> to vector<8x32xf32>
    %69 = arith.subf %63, %68 : vector<8x32xf32>
    %70 = arith.mulf %69, %69 : vector<8x32xf32>
    %cst_41 = arith.constant dense<0.000000e+00> : vector<8xf32>
    %71 = vector.multi_reduction <add>, %70, %cst_41 [1] : vector<8x32xf32> to vector<8xf32>
    %72 = vector.shape_cast %71 : vector<8xf32> to vector<8x1xf32>
    %cst_42 = arith.constant 3.200000e+01 : f32
    %73 = vector.broadcast %cst_42 : f32 to vector<8x1xf32>
    %74 = arith.divf %72, %73 : vector<8x1xf32>
    %cst_43 = arith.constant 9.99999974E-6 : f32
    %75 = vector.broadcast %cst_43 : f32 to vector<8x1xf32>
    %76 = arith.addf %74, %75 : vector<8x1xf32>
    %77 = math.rsqrt %76 : vector<8x1xf32>
    %78 = vector.broadcast %77 : vector<8x1xf32> to vector<8x32xf32>
    %79 = arith.mulf %69, %78 : vector<8x32xf32>
    %80 = vector.broadcast %58 : vector<1x32xf32> to vector<8x32xf32>
    %81 = arith.mulf %79, %80 : vector<8x32xf32>
    %82 = vector.broadcast %59 : vector<1x32xf32> to vector<8x32xf32>
    %83 = arith.addf %81, %82 : vector<8x32xf32>
    %c0_44 = arith.constant 0 : index
    %c0_45 = arith.constant 0 : index
    %84 = vector.load %arg19[%c0_44, %c0_45] : memref<3x6xf32, #tpu.memory_space<vmem>>, vector<1x6xf32>
    %c1_46 = arith.constant 1 : index
    %c0_47 = arith.constant 0 : index
    %85 = vector.load %arg19[%c1_46, %c0_47] : memref<3x6xf32, #tpu.memory_space<vmem>>, vector<1x6xf32>
    %c2_48 = arith.constant 2 : index
    %c0_49 = arith.constant 0 : index
    %86 = vector.load %arg19[%c2_48, %c0_49] : memref<3x6xf32, #tpu.memory_space<vmem>>, vector<1x6xf32>
    %c0_50 = arith.constant 0 : index
    %c0_51 = arith.constant 0 : index
    %87 = vector.load %arg21[%c0_50, %c0_51] : memref<3x32xf32, #tpu.memory_space<vmem>>, vector<1x32xf32>
    %c1_52 = arith.constant 1 : index
    %c0_53 = arith.constant 0 : index
    %88 = vector.load %arg21[%c1_52, %c0_53] : memref<3x32xf32, #tpu.memory_space<vmem>>, vector<1x32xf32>
    %c2_54 = arith.constant 2 : index
    %c0_55 = arith.constant 0 : index
    %89 = vector.load %arg21[%c2_54, %c0_55] : memref<3x32xf32, #tpu.memory_space<vmem>>, vector<1x32xf32>
    %c0_56 = arith.constant 0 : index
    %c0_57 = arith.constant 0 : index
    %c0_58 = arith.constant 0 : index
    %90 = vector.load %arg18[%c0_56, %c0_57, %c0_58] : memref<3x32x6xf32, #tpu.memory_space<vmem>>, vector<1x32x6xf32>
    %91 = vector.shape_cast %90 : vector<1x32x6xf32> to vector<32x6xf32>
    %cst_59 = arith.constant dense<0.000000e+00> : vector<8x6xf32>
    %92 = tpu.matmul %27, %91, %cst_59 {dimension_numbers = #tpu.dot_dimension_numbers<[1], [0], [0], [1], [0, 0, 1, 1], [], []>} : vector<8x32xf32>, vector<32x6xf32>, vector<8x6xf32> -> vector<8x6xf32>
    %c1_60 = arith.constant 1 : index
    %c0_61 = arith.constant 0 : index
    %c0_62 = arith.constant 0 : index
    %93 = vector.load %arg18[%c1_60, %c0_61, %c0_62] : memref<3x32x6xf32, #tpu.memory_space<vmem>>, vector<1x32x6xf32>
    %94 = vector.shape_cast %93 : vector<1x32x6xf32> to vector<32x6xf32>
    %cst_63 = arith.constant dense<0.000000e+00> : vector<8x6xf32>
    %95 = tpu.matmul %55, %94, %cst_63 {dimension_numbers = #tpu.dot_dimension_numbers<[1], [0], [0], [1], [0, 0, 1, 1], [], []>} : vector<8x32xf32>, vector<32x6xf32>, vector<8x6xf32> -> vector<8x6xf32>
    %96 = arith.addf %92, %95 : vector<8x6xf32>
    %c2_64 = arith.constant 2 : index
    %c0_65 = arith.constant 0 : index
    %c0_66 = arith.constant 0 : index
    %97 = vector.load %arg18[%c2_64, %c0_65, %c0_66] : memref<3x32x6xf32, #tpu.memory_space<vmem>>, vector<1x32x6xf32>
    %98 = vector.shape_cast %97 : vector<1x32x6xf32> to vector<32x6xf32>
    %cst_67 = arith.constant dense<0.000000e+00> : vector<8x6xf32>
    %99 = tpu.matmul %83, %98, %cst_67 {dimension_numbers = #tpu.dot_dimension_numbers<[1], [0], [0], [1], [0, 0, 1, 1], [], []>} : vector<8x32xf32>, vector<32x6xf32>, vector<8x6xf32> -> vector<8x6xf32>
    %100 = arith.addf %96, %99 : vector<8x6xf32>
    %101 = vector.broadcast %84 : vector<1x6xf32> to vector<8x6xf32>
    %102 = arith.addf %100, %101 : vector<8x6xf32>
    %cst_68 = arith.constant dense<0.000000e+00> : vector<8xf32>
    %103 = vector.multi_reduction <add>, %102, %cst_68 [1] : vector<8x6xf32> to vector<8xf32>
    %104 = vector.shape_cast %103 : vector<8xf32> to vector<8x1xf32>
    %cst_69 = arith.constant 6.000000e+00 : f32
    %105 = vector.broadcast %cst_69 : f32 to vector<8x1xf32>
    %106 = arith.divf %104, %105 : vector<8x1xf32>
    %107 = vector.broadcast %106 : vector<8x1xf32> to vector<8x6xf32>
    %108 = arith.subf %102, %107 : vector<8x6xf32>
    %109 = arith.mulf %108, %108 : vector<8x6xf32>
    %cst_70 = arith.constant dense<0.000000e+00> : vector<8xf32>
    %110 = vector.multi_reduction <add>, %109, %cst_70 [1] : vector<8x6xf32> to vector<8xf32>
    %111 = vector.shape_cast %110 : vector<8xf32> to vector<8x1xf32>
    %cst_71 = arith.constant 6.000000e+00 : f32
    %112 = vector.broadcast %cst_71 : f32 to vector<8x1xf32>
    %113 = arith.divf %111, %112 : vector<8x1xf32>
    %cst_72 = arith.constant 9.99999974E-6 : f32
    %114 = vector.broadcast %cst_72 : f32 to vector<8x1xf32>
    %115 = arith.addf %113, %114 : vector<8x1xf32>
    %116 = math.rsqrt %115 : vector<8x1xf32>
    %117 = vector.broadcast %116 : vector<8x1xf32> to vector<8x6xf32>
    %118 = arith.mulf %108, %117 : vector<8x6xf32>
    %119 = vector.broadcast %85 : vector<1x6xf32> to vector<8x6xf32>
    %120 = arith.mulf %118, %119 : vector<8x6xf32>
    %121 = vector.broadcast %86 : vector<1x6xf32> to vector<8x6xf32>
    %122 = arith.addf %120, %121 : vector<8x6xf32>
    %cst_73 = arith.constant 5.000000e-01 : f32
    %123 = vector.broadcast %cst_73 : f32 to vector<8x6xf32>
    %124 = arith.mulf %123, %122 : vector<8x6xf32>
    %cst_74 = arith.constant 2.000000e+00 : f32
    %125 = math.sqrt %cst_74 : f32
    %cst_75 = arith.constant 1.000000e+00 : f32
    %126 = arith.divf %cst_75, %125 : f32
    %127 = vector.broadcast %126 : f32 to vector<8x6xf32>
    %128 = arith.mulf %122, %127 : vector<8x6xf32>
    %129 = math.erf %128 : vector<8x6xf32>
    %cst_76 = arith.constant 1.000000e+00 : f32
    %130 = vector.broadcast %cst_76 : f32 to vector<8x6xf32>
    %131 = arith.addf %130, %129 : vector<8x6xf32>
    %132 = arith.mulf %124, %131 : vector<8x6xf32>
    %c0_77 = arith.constant 0 : index
    %c0_78 = arith.constant 0 : index
    %133 = vector.load %arg20[%c0_77, %c0_78] : memref<6x32xf32, #tpu.memory_space<vmem>>, vector<6x32xf32>
    %cst_79 = arith.constant dense<0.000000e+00> : vector<8x32xf32>
    %134 = tpu.matmul %132, %133, %cst_79 {dimension_numbers = #tpu.dot_dimension_numbers<[1], [0], [0], [1], [0, 0, 1, 1], [], []>} : vector<8x6xf32>, vector<6x32xf32>, vector<8x32xf32> -> vector<8x32xf32>
    %135 = vector.broadcast %87 : vector<1x32xf32> to vector<8x32xf32>
    %136 = arith.addf %134, %135 : vector<8x32xf32>
    %cst_80 = arith.constant dense<0.000000e+00> : vector<8xf32>
    %137 = vector.multi_reduction <add>, %136, %cst_80 [1] : vector<8x32xf32> to vector<8xf32>
    %138 = vector.shape_cast %137 : vector<8xf32> to vector<8x1xf32>
    %cst_81 = arith.constant 3.200000e+01 : f32
    %139 = vector.broadcast %cst_81 : f32 to vector<8x1xf32>
    %140 = arith.divf %138, %139 : vector<8x1xf32>
    %141 = vector.broadcast %140 : vector<8x1xf32> to vector<8x32xf32>
    %142 = arith.subf %136, %141 : vector<8x32xf32>
    %143 = arith.mulf %142, %142 : vector<8x32xf32>
    %cst_82 = arith.constant dense<0.000000e+00> : vector<8xf32>
    %144 = vector.multi_reduction <add>, %143, %cst_82 [1] : vector<8x32xf32> to vector<8xf32>
    %145 = vector.shape_cast %144 : vector<8xf32> to vector<8x1xf32>
    %cst_83 = arith.constant 3.200000e+01 : f32
    %146 = vector.broadcast %cst_83 : f32 to vector<8x1xf32>
    %147 = arith.divf %145, %146 : vector<8x1xf32>
    %cst_84 = arith.constant 9.99999974E-6 : f32
    %148 = vector.broadcast %cst_84 : f32 to vector<8x1xf32>
    %149 = arith.addf %147, %148 : vector<8x1xf32>
    %150 = math.rsqrt %149 : vector<8x1xf32>
    %151 = vector.broadcast %150 : vector<8x1xf32> to vector<8x32xf32>
    %152 = arith.mulf %142, %151 : vector<8x32xf32>
    %153 = vector.broadcast %88 : vector<1x32xf32> to vector<8x32xf32>
    %154 = arith.mulf %152, %153 : vector<8x32xf32>
    %155 = vector.broadcast %89 : vector<1x32xf32> to vector<8x32xf32>
    %156 = arith.addf %154, %155 : vector<8x32xf32>
    %c0_85 = arith.constant 0 : index
    %c0_86 = arith.constant 0 : index
    %157 = vector.load %arg5[%c0_85, %c0_86] : memref<8x32xf32, #tpu.memory_space<vmem>>, vector<8x32xf32>
    %c0_87 = arith.constant 0 : index
    %c0_88 = arith.constant 0 : index
    %158 = vector.load %arg6[%c0_87, %c0_88] : memref<8x32xf32, #tpu.memory_space<vmem>>, vector<8x32xf32>
    %c0_89 = arith.constant 0 : index
    %c0_90 = arith.constant 0 : index
    %159 = vector.load %arg7[%c0_89, %c0_90] : memref<8x32xf32, #tpu.memory_space<vmem>>, vector<8x32xf32>
    %c0_91 = arith.constant 0 : index
    %c0_92 = arith.constant 0 : index
    %160 = vector.load %arg23[%c0_91, %c0_92] : memref<3x6xf32, #tpu.memory_space<vmem>>, vector<1x6xf32>
    %c1_93 = arith.constant 1 : index
    %c0_94 = arith.constant 0 : index
    %161 = vector.load %arg23[%c1_93, %c0_94] : memref<3x6xf32, #tpu.memory_space<vmem>>, vector<1x6xf32>
    %c2_95 = arith.constant 2 : index
    %c0_96 = arith.constant 0 : index
    %162 = vector.load %arg23[%c2_95, %c0_96] : memref<3x6xf32, #tpu.memory_space<vmem>>, vector<1x6xf32>
    %c0_97 = arith.constant 0 : index
    %c0_98 = arith.constant 0 : index
    %163 = vector.load %arg25[%c0_97, %c0_98] : memref<3x32xf32, #tpu.memory_space<vmem>>, vector<1x32xf32>
    %c1_99 = arith.constant 1 : index
    %c0_100 = arith.constant 0 : index
    %164 = vector.load %arg25[%c1_99, %c0_100] : memref<3x32xf32, #tpu.memory_space<vmem>>, vector<1x32xf32>
    %c2_101 = arith.constant 2 : index
    %c0_102 = arith.constant 0 : index
    %165 = vector.load %arg25[%c2_101, %c0_102] : memref<3x32xf32, #tpu.memory_space<vmem>>, vector<1x32xf32>
    %c0_103 = arith.constant 0 : index
    %c0_104 = arith.constant 0 : index
    %c0_105 = arith.constant 0 : index
    %166 = vector.load %arg22[%c0_103, %c0_104, %c0_105] : memref<3x32x6xf32, #tpu.memory_space<vmem>>, vector<1x32x6xf32>
    %167 = vector.shape_cast %166 : vector<1x32x6xf32> to vector<32x6xf32>
    %cst_106 = arith.constant dense<0.000000e+00> : vector<8x6xf32>
    %168 = tpu.matmul %157, %167, %cst_106 {dimension_numbers = #tpu.dot_dimension_numbers<[1], [0], [0], [1], [0, 0, 1, 1], [], []>} : vector<8x32xf32>, vector<32x6xf32>, vector<8x6xf32> -> vector<8x6xf32>
    %c1_107 = arith.constant 1 : index
    %c0_108 = arith.constant 0 : index
    %c0_109 = arith.constant 0 : index
    %169 = vector.load %arg22[%c1_107, %c0_108, %c0_109] : memref<3x32x6xf32, #tpu.memory_space<vmem>>, vector<1x32x6xf32>
    %170 = vector.shape_cast %169 : vector<1x32x6xf32> to vector<32x6xf32>
    %cst_110 = arith.constant dense<0.000000e+00> : vector<8x6xf32>
    %171 = tpu.matmul %158, %170, %cst_110 {dimension_numbers = #tpu.dot_dimension_numbers<[1], [0], [0], [1], [0, 0, 1, 1], [], []>} : vector<8x32xf32>, vector<32x6xf32>, vector<8x6xf32> -> vector<8x6xf32>
    %172 = arith.addf %168, %171 : vector<8x6xf32>
    %c2_111 = arith.constant 2 : index
    %c0_112 = arith.constant 0 : index
    %c0_113 = arith.constant 0 : index
    %173 = vector.load %arg22[%c2_111, %c0_112, %c0_113] : memref<3x32x6xf32, #tpu.memory_space<vmem>>, vector<1x32x6xf32>
    %174 = vector.shape_cast %173 : vector<1x32x6xf32> to vector<32x6xf32>
    %cst_114 = arith.constant dense<0.000000e+00> : vector<8x6xf32>
    %175 = tpu.matmul %159, %174, %cst_114 {dimension_numbers = #tpu.dot_dimension_numbers<[1], [0], [0], [1], [0, 0, 1, 1], [], []>} : vector<8x32xf32>, vector<32x6xf32>, vector<8x6xf32> -> vector<8x6xf32>
    %176 = arith.addf %172, %175 : vector<8x6xf32>
    %177 = vector.broadcast %160 : vector<1x6xf32> to vector<8x6xf32>
    %178 = arith.addf %176, %177 : vector<8x6xf32>
    %cst_115 = arith.constant dense<0.000000e+00> : vector<8xf32>
    %179 = vector.multi_reduction <add>, %178, %cst_115 [1] : vector<8x6xf32> to vector<8xf32>
    %180 = vector.shape_cast %179 : vector<8xf32> to vector<8x1xf32>
    %cst_116 = arith.constant 6.000000e+00 : f32
    %181 = vector.broadcast %cst_116 : f32 to vector<8x1xf32>
    %182 = arith.divf %180, %181 : vector<8x1xf32>
    %183 = vector.broadcast %182 : vector<8x1xf32> to vector<8x6xf32>
    %184 = arith.subf %178, %183 : vector<8x6xf32>
    %185 = arith.mulf %184, %184 : vector<8x6xf32>
    %cst_117 = arith.constant dense<0.000000e+00> : vector<8xf32>
    %186 = vector.multi_reduction <add>, %185, %cst_117 [1] : vector<8x6xf32> to vector<8xf32>
    %187 = vector.shape_cast %186 : vector<8xf32> to vector<8x1xf32>
    %cst_118 = arith.constant 6.000000e+00 : f32
    %188 = vector.broadcast %cst_118 : f32 to vector<8x1xf32>
    %189 = arith.divf %187, %188 : vector<8x1xf32>
    %cst_119 = arith.constant 9.99999974E-6 : f32
    %190 = vector.broadcast %cst_119 : f32 to vector<8x1xf32>
    %191 = arith.addf %189, %190 : vector<8x1xf32>
    %192 = math.rsqrt %191 : vector<8x1xf32>
    %193 = vector.broadcast %192 : vector<8x1xf32> to vector<8x6xf32>
    %194 = arith.mulf %184, %193 : vector<8x6xf32>
    %195 = vector.broadcast %161 : vector<1x6xf32> to vector<8x6xf32>
    %196 = arith.mulf %194, %195 : vector<8x6xf32>
    %197 = vector.broadcast %162 : vector<1x6xf32> to vector<8x6xf32>
    %198 = arith.addf %196, %197 : vector<8x6xf32>
    %cst_120 = arith.constant 5.000000e-01 : f32
    %199 = vector.broadcast %cst_120 : f32 to vector<8x6xf32>
    %200 = arith.mulf %199, %198 : vector<8x6xf32>
    %cst_121 = arith.constant 2.000000e+00 : f32
    %201 = math.sqrt %cst_121 : f32
    %cst_122 = arith.constant 1.000000e+00 : f32
    %202 = arith.divf %cst_122, %201 : f32
    %203 = vector.broadcast %202 : f32 to vector<8x6xf32>
    %204 = arith.mulf %198, %203 : vector<8x6xf32>
    %205 = math.erf %204 : vector<8x6xf32>
    %cst_123 = arith.constant 1.000000e+00 : f32
    %206 = vector.broadcast %cst_123 : f32 to vector<8x6xf32>
    %207 = arith.addf %206, %205 : vector<8x6xf32>
    %208 = arith.mulf %200, %207 : vector<8x6xf32>
    %c0_124 = arith.constant 0 : index
    %c0_125 = arith.constant 0 : index
    %209 = vector.load %arg24[%c0_124, %c0_125] : memref<6x32xf32, #tpu.memory_space<vmem>>, vector<6x32xf32>
    %cst_126 = arith.constant dense<0.000000e+00> : vector<8x32xf32>
    %210 = tpu.matmul %208, %209, %cst_126 {dimension_numbers = #tpu.dot_dimension_numbers<[1], [0], [0], [1], [0, 0, 1, 1], [], []>} : vector<8x6xf32>, vector<6x32xf32>, vector<8x32xf32> -> vector<8x32xf32>
    %211 = vector.broadcast %163 : vector<1x32xf32> to vector<8x32xf32>
    %212 = arith.addf %210, %211 : vector<8x32xf32>
    %cst_127 = arith.constant dense<0.000000e+00> : vector<8xf32>
    %213 = vector.multi_reduction <add>, %212, %cst_127 [1] : vector<8x32xf32> to vector<8xf32>
    %214 = vector.shape_cast %213 : vector<8xf32> to vector<8x1xf32>
    %cst_128 = arith.constant 3.200000e+01 : f32
    %215 = vector.broadcast %cst_128 : f32 to vector<8x1xf32>
    %216 = arith.divf %214, %215 : vector<8x1xf32>
    %217 = vector.broadcast %216 : vector<8x1xf32> to vector<8x32xf32>
    %218 = arith.subf %212, %217 : vector<8x32xf32>
    %219 = arith.mulf %218, %218 : vector<8x32xf32>
    %cst_129 = arith.constant dense<0.000000e+00> : vector<8xf32>
    %220 = vector.multi_reduction <add>, %219, %cst_129 [1] : vector<8x32xf32> to vector<8xf32>
    %221 = vector.shape_cast %220 : vector<8xf32> to vector<8x1xf32>
    %cst_130 = arith.constant 3.200000e+01 : f32
    %222 = vector.broadcast %cst_130 : f32 to vector<8x1xf32>
    %223 = arith.divf %221, %222 : vector<8x1xf32>
    %cst_131 = arith.constant 9.99999974E-6 : f32
    %224 = vector.broadcast %cst_131 : f32 to vector<8x1xf32>
    %225 = arith.addf %223, %224 : vector<8x1xf32>
    %226 = math.rsqrt %225 : vector<8x1xf32>
    %227 = vector.broadcast %226 : vector<8x1xf32> to vector<8x32xf32>
    %228 = arith.mulf %218, %227 : vector<8x32xf32>
    %229 = vector.broadcast %164 : vector<1x32xf32> to vector<8x32xf32>
    %230 = arith.mulf %228, %229 : vector<8x32xf32>
    %231 = vector.broadcast %165 : vector<1x32xf32> to vector<8x32xf32>
    %232 = arith.addf %230, %231 : vector<8x32xf32>
    %c0_132 = arith.constant 0 : index
    %c0_133 = arith.constant 0 : index
    %233 = vector.load %arg8[%c0_132, %c0_133] : memref<8x32xf32, #tpu.memory_space<vmem>>, vector<8x32xf32>
    %c0_134 = arith.constant 0 : index
    %c0_135 = arith.constant 0 : index
    %234 = vector.load %arg9[%c0_134, %c0_135] : memref<8x32xf32, #tpu.memory_space<vmem>>, vector<8x32xf32>
    %c0_136 = arith.constant 0 : index
    %c0_137 = arith.constant 0 : index
    %235 = vector.load %arg10[%c0_136, %c0_137] : memref<8x32xf32, #tpu.memory_space<vmem>>, vector<8x32xf32>
    %c0_138 = arith.constant 0 : index
    %c0_139 = arith.constant 0 : index
    %236 = vector.load %arg27[%c0_138, %c0_139] : memref<3x6xf32, #tpu.memory_space<vmem>>, vector<1x6xf32>
    %c1_140 = arith.constant 1 : index
    %c0_141 = arith.constant 0 : index
    %237 = vector.load %arg27[%c1_140, %c0_141] : memref<3x6xf32, #tpu.memory_space<vmem>>, vector<1x6xf32>
    %c2_142 = arith.constant 2 : index
    %c0_143 = arith.constant 0 : index
    %238 = vector.load %arg27[%c2_142, %c0_143] : memref<3x6xf32, #tpu.memory_space<vmem>>, vector<1x6xf32>
    %c0_144 = arith.constant 0 : index
    %c0_145 = arith.constant 0 : index
    %239 = vector.load %arg29[%c0_144, %c0_145] : memref<3x32xf32, #tpu.memory_space<vmem>>, vector<1x32xf32>
    %c1_146 = arith.constant 1 : index
    %c0_147 = arith.constant 0 : index
    %240 = vector.load %arg29[%c1_146, %c0_147] : memref<3x32xf32, #tpu.memory_space<vmem>>, vector<1x32xf32>
    %c2_148 = arith.constant 2 : index
    %c0_149 = arith.constant 0 : index
    %241 = vector.load %arg29[%c2_148, %c0_149] : memref<3x32xf32, #tpu.memory_space<vmem>>, vector<1x32xf32>
    %c0_150 = arith.constant 0 : index
    %c0_151 = arith.constant 0 : index
    %c0_152 = arith.constant 0 : index
    %242 = vector.load %arg26[%c0_150, %c0_151, %c0_152] : memref<3x32x6xf32, #tpu.memory_space<vmem>>, vector<1x32x6xf32>
    %243 = vector.shape_cast %242 : vector<1x32x6xf32> to vector<32x6xf32>
    %cst_153 = arith.constant dense<0.000000e+00> : vector<8x6xf32>
    %244 = tpu.matmul %233, %243, %cst_153 {dimension_numbers = #tpu.dot_dimension_numbers<[1], [0], [0], [1], [0, 0, 1, 1], [], []>} : vector<8x32xf32>, vector<32x6xf32>, vector<8x6xf32> -> vector<8x6xf32>
    %c1_154 = arith.constant 1 : index
    %c0_155 = arith.constant 0 : index
    %c0_156 = arith.constant 0 : index
    %245 = vector.load %arg26[%c1_154, %c0_155, %c0_156] : memref<3x32x6xf32, #tpu.memory_space<vmem>>, vector<1x32x6xf32>
    %246 = vector.shape_cast %245 : vector<1x32x6xf32> to vector<32x6xf32>
    %cst_157 = arith.constant dense<0.000000e+00> : vector<8x6xf32>
    %247 = tpu.matmul %234, %246, %cst_157 {dimension_numbers = #tpu.dot_dimension_numbers<[1], [0], [0], [1], [0, 0, 1, 1], [], []>} : vector<8x32xf32>, vector<32x6xf32>, vector<8x6xf32> -> vector<8x6xf32>
    %248 = arith.addf %244, %247 : vector<8x6xf32>
    %c2_158 = arith.constant 2 : index
    %c0_159 = arith.constant 0 : index
    %c0_160 = arith.constant 0 : index
    %249 = vector.load %arg26[%c2_158, %c0_159, %c0_160] : memref<3x32x6xf32, #tpu.memory_space<vmem>>, vector<1x32x6xf32>
    %250 = vector.shape_cast %249 : vector<1x32x6xf32> to vector<32x6xf32>
    %cst_161 = arith.constant dense<0.000000e+00> : vector<8x6xf32>
    %251 = tpu.matmul %235, %250, %cst_161 {dimension_numbers = #tpu.dot_dimension_numbers<[1], [0], [0], [1], [0, 0, 1, 1], [], []>} : vector<8x32xf32>, vector<32x6xf32>, vector<8x6xf32> -> vector<8x6xf32>
    %252 = arith.addf %248, %251 : vector<8x6xf32>
    %253 = vector.broadcast %236 : vector<1x6xf32> to vector<8x6xf32>
    %254 = arith.addf %252, %253 : vector<8x6xf32>
    %cst_162 = arith.constant dense<0.000000e+00> : vector<8xf32>
    %255 = vector.multi_reduction <add>, %254, %cst_162 [1] : vector<8x6xf32> to vector<8xf32>
    %256 = vector.shape_cast %255 : vector<8xf32> to vector<8x1xf32>
    %cst_163 = arith.constant 6.000000e+00 : f32
    %257 = vector.broadcast %cst_163 : f32 to vector<8x1xf32>
    %258 = arith.divf %256, %257 : vector<8x1xf32>
    %259 = vector.broadcast %258 : vector<8x1xf32> to vector<8x6xf32>
    %260 = arith.subf %254, %259 : vector<8x6xf32>
    %261 = arith.mulf %260, %260 : vector<8x6xf32>
    %cst_164 = arith.constant dense<0.000000e+00> : vector<8xf32>
    %262 = vector.multi_reduction <add>, %261, %cst_164 [1] : vector<8x6xf32> to vector<8xf32>
    %263 = vector.shape_cast %262 : vector<8xf32> to vector<8x1xf32>
    %cst_165 = arith.constant 6.000000e+00 : f32
    %264 = vector.broadcast %cst_165 : f32 to vector<8x1xf32>
    %265 = arith.divf %263, %264 : vector<8x1xf32>
    %cst_166 = arith.constant 9.99999974E-6 : f32
    %266 = vector.broadcast %cst_166 : f32 to vector<8x1xf32>
    %267 = arith.addf %265, %266 : vector<8x1xf32>
    %268 = math.rsqrt %267 : vector<8x1xf32>
    %269 = vector.broadcast %268 : vector<8x1xf32> to vector<8x6xf32>
    %270 = arith.mulf %260, %269 : vector<8x6xf32>
    %271 = vector.broadcast %237 : vector<1x6xf32> to vector<8x6xf32>
    %272 = arith.mulf %270, %271 : vector<8x6xf32>
    %273 = vector.broadcast %238 : vector<1x6xf32> to vector<8x6xf32>
    %274 = arith.addf %272, %273 : vector<8x6xf32>
    %cst_167 = arith.constant 5.000000e-01 : f32
    %275 = vector.broadcast %cst_167 : f32 to vector<8x6xf32>
    %276 = arith.mulf %275, %274 : vector<8x6xf32>
    %cst_168 = arith.constant 2.000000e+00 : f32
    %277 = math.sqrt %cst_168 : f32
    %cst_169 = arith.constant 1.000000e+00 : f32
    %278 = arith.divf %cst_169, %277 : f32
    %279 = vector.broadcast %278 : f32 to vector<8x6xf32>
    %280 = arith.mulf %274, %279 : vector<8x6xf32>
    %281 = math.erf %280 : vector<8x6xf32>
    %cst_170 = arith.constant 1.000000e+00 : f32
    %282 = vector.broadcast %cst_170 : f32 to vector<8x6xf32>
    %283 = arith.addf %282, %281 : vector<8x6xf32>
    %284 = arith.mulf %276, %283 : vector<8x6xf32>
    %c0_171 = arith.constant 0 : index
    %c0_172 = arith.constant 0 : index
    %285 = vector.load %arg28[%c0_171, %c0_172] : memref<6x32xf32, #tpu.memory_space<vmem>>, vector<6x32xf32>
    %cst_173 = arith.constant dense<0.000000e+00> : vector<8x32xf32>
    %286 = tpu.matmul %284, %285, %cst_173 {dimension_numbers = #tpu.dot_dimension_numbers<[1], [0], [0], [1], [0, 0, 1, 1], [], []>} : vector<8x6xf32>, vector<6x32xf32>, vector<8x32xf32> -> vector<8x32xf32>
    %287 = vector.broadcast %239 : vector<1x32xf32> to vector<8x32xf32>
    %288 = arith.addf %286, %287 : vector<8x32xf32>
    %cst_174 = arith.constant dense<0.000000e+00> : vector<8xf32>
    %289 = vector.multi_reduction <add>, %288, %cst_174 [1] : vector<8x32xf32> to vector<8xf32>
    %290 = vector.shape_cast %289 : vector<8xf32> to vector<8x1xf32>
    %cst_175 = arith.constant 3.200000e+01 : f32
    %291 = vector.broadcast %cst_175 : f32 to vector<8x1xf32>
    %292 = arith.divf %290, %291 : vector<8x1xf32>
    %293 = vector.broadcast %292 : vector<8x1xf32> to vector<8x32xf32>
    %294 = arith.subf %288, %293 : vector<8x32xf32>
    %295 = arith.mulf %294, %294 : vector<8x32xf32>
    %cst_176 = arith.constant dense<0.000000e+00> : vector<8xf32>
    %296 = vector.multi_reduction <add>, %295, %cst_176 [1] : vector<8x32xf32> to vector<8xf32>
    %297 = vector.shape_cast %296 : vector<8xf32> to vector<8x1xf32>
    %cst_177 = arith.constant 3.200000e+01 : f32
    %298 = vector.broadcast %cst_177 : f32 to vector<8x1xf32>
    %299 = arith.divf %297, %298 : vector<8x1xf32>
    %cst_178 = arith.constant 9.99999974E-6 : f32
    %300 = vector.broadcast %cst_178 : f32 to vector<8x1xf32>
    %301 = arith.addf %299, %300 : vector<8x1xf32>
    %302 = math.rsqrt %301 : vector<8x1xf32>
    %303 = vector.broadcast %302 : vector<8x1xf32> to vector<8x32xf32>
    %304 = arith.mulf %294, %303 : vector<8x32xf32>
    %305 = vector.broadcast %240 : vector<1x32xf32> to vector<8x32xf32>
    %306 = arith.mulf %304, %305 : vector<8x32xf32>
    %307 = vector.broadcast %241 : vector<1x32xf32> to vector<8x32xf32>
    %308 = arith.addf %306, %307 : vector<8x32xf32>
    %c0_179 = arith.constant 0 : index
    %c0_180 = arith.constant 0 : index
    %309 = vector.load %arg11[%c0_179, %c0_180] : memref<8x32xf32, #tpu.memory_space<vmem>>, vector<8x32xf32>
    %c0_181 = arith.constant 0 : index
    %c0_182 = arith.constant 0 : index
    %310 = vector.load %arg35[%c0_181, %c0_182] : memref<3x16xf32, #tpu.memory_space<vmem>>, vector<1x16xf32>
    %c1_183 = arith.constant 1 : index
    %c0_184 = arith.constant 0 : index
    %311 = vector.load %arg35[%c1_183, %c0_184] : memref<3x16xf32, #tpu.memory_space<vmem>>, vector<1x16xf32>
    %c2_185 = arith.constant 2 : index
    %c0_186 = arith.constant 0 : index
    %312 = vector.load %arg35[%c2_185, %c0_186] : memref<3x16xf32, #tpu.memory_space<vmem>>, vector<1x16xf32>
    %c0_187 = arith.constant 0 : index
    %c0_188 = arith.constant 0 : index
    %313 = vector.load %arg37[%c0_187, %c0_188] : memref<3x32xf32, #tpu.memory_space<vmem>>, vector<1x32xf32>
    %c1_189 = arith.constant 1 : index
    %c0_190 = arith.constant 0 : index
    %314 = vector.load %arg37[%c1_189, %c0_190] : memref<3x32xf32, #tpu.memory_space<vmem>>, vector<1x32xf32>
    %c2_191 = arith.constant 2 : index
    %c0_192 = arith.constant 0 : index
    %315 = vector.load %arg37[%c2_191, %c0_192] : memref<3x32xf32, #tpu.memory_space<vmem>>, vector<1x32xf32>
    %c0_193 = arith.constant 0 : index
    %c0_194 = arith.constant 0 : index
    %316 = vector.load %arg34[%c0_193, %c0_194] : memref<32x16xf32, #tpu.memory_space<vmem>>, vector<32x16xf32>
    %cst_195 = arith.constant dense<0.000000e+00> : vector<8x16xf32>
    %317 = tpu.matmul %309, %316, %cst_195 {dimension_numbers = #tpu.dot_dimension_numbers<[1], [0], [0], [1], [0, 0, 1, 1], [], []>} : vector<8x32xf32>, vector<32x16xf32>, vector<8x16xf32> -> vector<8x16xf32>
    %318 = vector.broadcast %310 : vector<1x16xf32> to vector<8x16xf32>
    %319 = arith.addf %317, %318 : vector<8x16xf32>
    %cst_196 = arith.constant dense<0.000000e+00> : vector<8xf32>
    %320 = vector.multi_reduction <add>, %319, %cst_196 [1] : vector<8x16xf32> to vector<8xf32>
    %321 = vector.shape_cast %320 : vector<8xf32> to vector<8x1xf32>
    %cst_197 = arith.constant 1.600000e+01 : f32
    %322 = vector.broadcast %cst_197 : f32 to vector<8x1xf32>
    %323 = arith.divf %321, %322 : vector<8x1xf32>
    %324 = vector.broadcast %323 : vector<8x1xf32> to vector<8x16xf32>
    %325 = arith.subf %319, %324 : vector<8x16xf32>
    %326 = arith.mulf %325, %325 : vector<8x16xf32>
    %cst_198 = arith.constant dense<0.000000e+00> : vector<8xf32>
    %327 = vector.multi_reduction <add>, %326, %cst_198 [1] : vector<8x16xf32> to vector<8xf32>
    %328 = vector.shape_cast %327 : vector<8xf32> to vector<8x1xf32>
    %cst_199 = arith.constant 1.600000e+01 : f32
    %329 = vector.broadcast %cst_199 : f32 to vector<8x1xf32>
    %330 = arith.divf %328, %329 : vector<8x1xf32>
    %cst_200 = arith.constant 9.99999974E-6 : f32
    %331 = vector.broadcast %cst_200 : f32 to vector<8x1xf32>
    %332 = arith.addf %330, %331 : vector<8x1xf32>
    %333 = math.rsqrt %332 : vector<8x1xf32>
    %334 = vector.broadcast %333 : vector<8x1xf32> to vector<8x16xf32>
    %335 = arith.mulf %325, %334 : vector<8x16xf32>
    %336 = vector.broadcast %311 : vector<1x16xf32> to vector<8x16xf32>
    %337 = arith.mulf %335, %336 : vector<8x16xf32>
    %338 = vector.broadcast %312 : vector<1x16xf32> to vector<8x16xf32>
    %339 = arith.addf %337, %338 : vector<8x16xf32>
    %cst_201 = arith.constant 5.000000e-01 : f32
    %340 = vector.broadcast %cst_201 : f32 to vector<8x16xf32>
    %341 = arith.mulf %340, %339 : vector<8x16xf32>
    %cst_202 = arith.constant 2.000000e+00 : f32
    %342 = math.sqrt %cst_202 : f32
    %cst_203 = arith.constant 1.000000e+00 : f32
    %343 = arith.divf %cst_203, %342 : f32
    %344 = vector.broadcast %343 : f32 to vector<8x16xf32>
    %345 = arith.mulf %339, %344 : vector<8x16xf32>
    %346 = math.erf %345 : vector<8x16xf32>
    %cst_204 = arith.constant 1.000000e+00 : f32
    %347 = vector.broadcast %cst_204 : f32 to vector<8x16xf32>
    %348 = arith.addf %347, %346 : vector<8x16xf32>
    %349 = arith.mulf %341, %348 : vector<8x16xf32>
    %c0_205 = arith.constant 0 : index
    %c0_206 = arith.constant 0 : index
    %350 = vector.load %arg36[%c0_205, %c0_206] : memref<16x32xf32, #tpu.memory_space<vmem>>, vector<16x32xf32>
    %cst_207 = arith.constant dense<0.000000e+00> : vector<8x32xf32>
    %351 = tpu.matmul %349, %350, %cst_207 {dimension_numbers = #tpu.dot_dimension_numbers<[1], [0], [0], [1], [0, 0, 1, 1], [], []>} : vector<8x16xf32>, vector<16x32xf32>, vector<8x32xf32> -> vector<8x32xf32>
    %352 = vector.broadcast %313 : vector<1x32xf32> to vector<8x32xf32>
    %353 = arith.addf %351, %352 : vector<8x32xf32>
    %cst_208 = arith.constant dense<0.000000e+00> : vector<8xf32>
    %354 = vector.multi_reduction <add>, %353, %cst_208 [1] : vector<8x32xf32> to vector<8xf32>
    %355 = vector.shape_cast %354 : vector<8xf32> to vector<8x1xf32>
    %cst_209 = arith.constant 3.200000e+01 : f32
    %356 = vector.broadcast %cst_209 : f32 to vector<8x1xf32>
    %357 = arith.divf %355, %356 : vector<8x1xf32>
    %358 = vector.broadcast %357 : vector<8x1xf32> to vector<8x32xf32>
    %359 = arith.subf %353, %358 : vector<8x32xf32>
    %360 = arith.mulf %359, %359 : vector<8x32xf32>
    %cst_210 = arith.constant dense<0.000000e+00> : vector<8xf32>
    %361 = vector.multi_reduction <add>, %360, %cst_210 [1] : vector<8x32xf32> to vector<8xf32>
    %362 = vector.shape_cast %361 : vector<8xf32> to vector<8x1xf32>
    %cst_211 = arith.constant 3.200000e+01 : f32
    %363 = vector.broadcast %cst_211 : f32 to vector<8x1xf32>
    %364 = arith.divf %362, %363 : vector<8x1xf32>
    %cst_212 = arith.constant 9.99999974E-6 : f32
    %365 = vector.broadcast %cst_212 : f32 to vector<8x1xf32>
    %366 = arith.addf %364, %365 : vector<8x1xf32>
    %367 = math.rsqrt %366 : vector<8x1xf32>
    %368 = vector.broadcast %367 : vector<8x1xf32> to vector<8x32xf32>
    %369 = arith.mulf %359, %368 : vector<8x32xf32>
    %370 = vector.broadcast %314 : vector<1x32xf32> to vector<8x32xf32>
    %371 = arith.mulf %369, %370 : vector<8x32xf32>
    %372 = vector.broadcast %315 : vector<1x32xf32> to vector<8x32xf32>
    %373 = arith.addf %371, %372 : vector<8x32xf32>
    %c0_213 = arith.constant 0 : index
    %c0_214 = arith.constant 0 : index
    %374 = vector.load %arg31[%c0_213, %c0_214] : memref<3x6xf32, #tpu.memory_space<vmem>>, vector<1x6xf32>
    %c1_215 = arith.constant 1 : index
    %c0_216 = arith.constant 0 : index
    %375 = vector.load %arg31[%c1_215, %c0_216] : memref<3x6xf32, #tpu.memory_space<vmem>>, vector<1x6xf32>
    %c2_217 = arith.constant 2 : index
    %c0_218 = arith.constant 0 : index
    %376 = vector.load %arg31[%c2_217, %c0_218] : memref<3x6xf32, #tpu.memory_space<vmem>>, vector<1x6xf32>
    %c0_219 = arith.constant 0 : index
    %c0_220 = arith.constant 0 : index
    %377 = vector.load %arg33[%c0_219, %c0_220] : memref<3x32xf32, #tpu.memory_space<vmem>>, vector<1x32xf32>
    %c1_221 = arith.constant 1 : index
    %c0_222 = arith.constant 0 : index
    %378 = vector.load %arg33[%c1_221, %c0_222] : memref<3x32xf32, #tpu.memory_space<vmem>>, vector<1x32xf32>
    %c2_223 = arith.constant 2 : index
    %c0_224 = arith.constant 0 : index
    %379 = vector.load %arg33[%c2_223, %c0_224] : memref<3x32xf32, #tpu.memory_space<vmem>>, vector<1x32xf32>
    %c0_225 = arith.constant 0 : index
    %c0_226 = arith.constant 0 : index
    %c0_227 = arith.constant 0 : index
    %380 = vector.load %arg30[%c0_225, %c0_226, %c0_227] : memref<3x32x6xf32, #tpu.memory_space<vmem>>, vector<1x32x6xf32>
    %381 = vector.shape_cast %380 : vector<1x32x6xf32> to vector<32x6xf32>
    %cst_228 = arith.constant dense<0.000000e+00> : vector<8x6xf32>
    %382 = tpu.matmul %232, %381, %cst_228 {dimension_numbers = #tpu.dot_dimension_numbers<[1], [0], [0], [1], [0, 0, 1, 1], [], []>} : vector<8x32xf32>, vector<32x6xf32>, vector<8x6xf32> -> vector<8x6xf32>
    %c1_229 = arith.constant 1 : index
    %c0_230 = arith.constant 0 : index
    %c0_231 = arith.constant 0 : index
    %383 = vector.load %arg30[%c1_229, %c0_230, %c0_231] : memref<3x32x6xf32, #tpu.memory_space<vmem>>, vector<1x32x6xf32>
    %384 = vector.shape_cast %383 : vector<1x32x6xf32> to vector<32x6xf32>
    %cst_232 = arith.constant dense<0.000000e+00> : vector<8x6xf32>
    %385 = tpu.matmul %308, %384, %cst_232 {dimension_numbers = #tpu.dot_dimension_numbers<[1], [0], [0], [1], [0, 0, 1, 1], [], []>} : vector<8x32xf32>, vector<32x6xf32>, vector<8x6xf32> -> vector<8x6xf32>
    %386 = arith.addf %382, %385 : vector<8x6xf32>
    %c2_233 = arith.constant 2 : index
    %c0_234 = arith.constant 0 : index
    %c0_235 = arith.constant 0 : index
    %387 = vector.load %arg30[%c2_233, %c0_234, %c0_235] : memref<3x32x6xf32, #tpu.memory_space<vmem>>, vector<1x32x6xf32>
    %388 = vector.shape_cast %387 : vector<1x32x6xf32> to vector<32x6xf32>
    %cst_236 = arith.constant dense<0.000000e+00> : vector<8x6xf32>
    %389 = tpu.matmul %373, %388, %cst_236 {dimension_numbers = #tpu.dot_dimension_numbers<[1], [0], [0], [1], [0, 0, 1, 1], [], []>} : vector<8x32xf32>, vector<32x6xf32>, vector<8x6xf32> -> vector<8x6xf32>
    %390 = arith.addf %386, %389 : vector<8x6xf32>
    %391 = vector.broadcast %374 : vector<1x6xf32> to vector<8x6xf32>
    %392 = arith.addf %390, %391 : vector<8x6xf32>
    %cst_237 = arith.constant dense<0.000000e+00> : vector<8xf32>
    %393 = vector.multi_reduction <add>, %392, %cst_237 [1] : vector<8x6xf32> to vector<8xf32>
    %394 = vector.shape_cast %393 : vector<8xf32> to vector<8x1xf32>
    %cst_238 = arith.constant 6.000000e+00 : f32
    %395 = vector.broadcast %cst_238 : f32 to vector<8x1xf32>
    %396 = arith.divf %394, %395 : vector<8x1xf32>
    %397 = vector.broadcast %396 : vector<8x1xf32> to vector<8x6xf32>
    %398 = arith.subf %392, %397 : vector<8x6xf32>
    %399 = arith.mulf %398, %398 : vector<8x6xf32>
    %cst_239 = arith.constant dense<0.000000e+00> : vector<8xf32>
    %400 = vector.multi_reduction <add>, %399, %cst_239 [1] : vector<8x6xf32> to vector<8xf32>
    %401 = vector.shape_cast %400 : vector<8xf32> to vector<8x1xf32>
    %cst_240 = arith.constant 6.000000e+00 : f32
    %402 = vector.broadcast %cst_240 : f32 to vector<8x1xf32>
    %403 = arith.divf %401, %402 : vector<8x1xf32>
    %cst_241 = arith.constant 9.99999974E-6 : f32
    %404 = vector.broadcast %cst_241 : f32 to vector<8x1xf32>
    %405 = arith.addf %403, %404 : vector<8x1xf32>
    %406 = math.rsqrt %405 : vector<8x1xf32>
    %407 = vector.broadcast %406 : vector<8x1xf32> to vector<8x6xf32>
    %408 = arith.mulf %398, %407 : vector<8x6xf32>
    %409 = vector.broadcast %375 : vector<1x6xf32> to vector<8x6xf32>
    %410 = arith.mulf %408, %409 : vector<8x6xf32>
    %411 = vector.broadcast %376 : vector<1x6xf32> to vector<8x6xf32>
    %412 = arith.addf %410, %411 : vector<8x6xf32>
    %cst_242 = arith.constant 5.000000e-01 : f32
    %413 = vector.broadcast %cst_242 : f32 to vector<8x6xf32>
    %414 = arith.mulf %413, %412 : vector<8x6xf32>
    %cst_243 = arith.constant 2.000000e+00 : f32
    %415 = math.sqrt %cst_243 : f32
    %cst_244 = arith.constant 1.000000e+00 : f32
    %416 = arith.divf %cst_244, %415 : f32
    %417 = vector.broadcast %416 : f32 to vector<8x6xf32>
    %418 = arith.mulf %412, %417 : vector<8x6xf32>
    %419 = math.erf %418 : vector<8x6xf32>
    %cst_245 = arith.constant 1.000000e+00 : f32
    %420 = vector.broadcast %cst_245 : f32 to vector<8x6xf32>
    %421 = arith.addf %420, %419 : vector<8x6xf32>
    %422 = arith.mulf %414, %421 : vector<8x6xf32>
    %c0_246 = arith.constant 0 : index
    %c0_247 = arith.constant 0 : index
    %423 = vector.load %arg32[%c0_246, %c0_247] : memref<6x32xf32, #tpu.memory_space<vmem>>, vector<6x32xf32>
    %cst_248 = arith.constant dense<0.000000e+00> : vector<8x32xf32>
    %424 = tpu.matmul %422, %423, %cst_248 {dimension_numbers = #tpu.dot_dimension_numbers<[1], [0], [0], [1], [0, 0, 1, 1], [], []>} : vector<8x6xf32>, vector<6x32xf32>, vector<8x32xf32> -> vector<8x32xf32>
    %425 = vector.broadcast %377 : vector<1x32xf32> to vector<8x32xf32>
    %426 = arith.addf %424, %425 : vector<8x32xf32>
    %cst_249 = arith.constant dense<0.000000e+00> : vector<8xf32>
    %427 = vector.multi_reduction <add>, %426, %cst_249 [1] : vector<8x32xf32> to vector<8xf32>
    %428 = vector.shape_cast %427 : vector<8xf32> to vector<8x1xf32>
    %cst_250 = arith.constant 3.200000e+01 : f32
    %429 = vector.broadcast %cst_250 : f32 to vector<8x1xf32>
    %430 = arith.divf %428, %429 : vector<8x1xf32>
    %431 = vector.broadcast %430 : vector<8x1xf32> to vector<8x32xf32>
    %432 = arith.subf %426, %431 : vector<8x32xf32>
    %433 = arith.mulf %432, %432 : vector<8x32xf32>
    %cst_251 = arith.constant dense<0.000000e+00> : vector<8xf32>
    %434 = vector.multi_reduction <add>, %433, %cst_251 [1] : vector<8x32xf32> to vector<8xf32>
    %435 = vector.shape_cast %434 : vector<8xf32> to vector<8x1xf32>
    %cst_252 = arith.constant 3.200000e+01 : f32
    %436 = vector.broadcast %cst_252 : f32 to vector<8x1xf32>
    %437 = arith.divf %435, %436 : vector<8x1xf32>
    %cst_253 = arith.constant 9.99999974E-6 : f32
    %438 = vector.broadcast %cst_253 : f32 to vector<8x1xf32>
    %439 = arith.addf %437, %438 : vector<8x1xf32>
    %440 = math.rsqrt %439 : vector<8x1xf32>
    %441 = vector.broadcast %440 : vector<8x1xf32> to vector<8x32xf32>
    %442 = arith.mulf %432, %441 : vector<8x32xf32>
    %443 = vector.broadcast %378 : vector<1x32xf32> to vector<8x32xf32>
    %444 = arith.mulf %442, %443 : vector<8x32xf32>
    %445 = vector.broadcast %379 : vector<1x32xf32> to vector<8x32xf32>
    %446 = arith.addf %444, %445 : vector<8x32xf32>
    %c0_254 = arith.constant 0 : index
    %c0_255 = arith.constant 0 : index
    %447 = memref.load %arg1[%c0_254, %c0_255] : memref<1x1xf32, #tpu.memory_space<smem>>
    %cst_256 = arith.constant 0.000000e+00 : f32
    %448 = arith.subf %cst_256, %447 : f32
    %449 = vector.broadcast %448 : f32 to vector<1x1xf32>
    %450 = math.exp %449 : vector<1x1xf32>
    %cst_257 = arith.constant 1.000000e+00 : f32
    %451 = vector.broadcast %cst_257 : f32 to vector<1x1xf32>
    %452 = arith.addf %451, %450 : vector<1x1xf32>
    %cst_258 = arith.constant 1.000000e+00 : f32
    %453 = vector.broadcast %cst_258 : f32 to vector<1x1xf32>
    %454 = arith.divf %453, %452 : vector<1x1xf32>
    %455 = vector.broadcast %454 : vector<1x1xf32> to vector<8x32xf32>
    %456 = arith.mulf %455, %446 : vector<8x32xf32>
    %457 = arith.subf %156, %456 : vector<8x32xf32>
    %c0_259 = arith.constant 0 : index
    %c0_260 = arith.constant 0 : index
    %458 = vector.load %arg39[%c0_259, %c0_260] : memref<3x16xf32, #tpu.memory_space<vmem>>, vector<1x16xf32>
    %c1_261 = arith.constant 1 : index
    %c0_262 = arith.constant 0 : index
    %459 = vector.load %arg39[%c1_261, %c0_262] : memref<3x16xf32, #tpu.memory_space<vmem>>, vector<1x16xf32>
    %c2_263 = arith.constant 2 : index
    %c0_264 = arith.constant 0 : index
    %460 = vector.load %arg39[%c2_263, %c0_264] : memref<3x16xf32, #tpu.memory_space<vmem>>, vector<1x16xf32>
    %c0_265 = arith.constant 0 : index
    %c0_266 = arith.constant 0 : index
    %461 = vector.load %arg41[%c0_265, %c0_266] : memref<3x32xf32, #tpu.memory_space<vmem>>, vector<1x32xf32>
    %c1_267 = arith.constant 1 : index
    %c0_268 = arith.constant 0 : index
    %462 = vector.load %arg41[%c1_267, %c0_268] : memref<3x32xf32, #tpu.memory_space<vmem>>, vector<1x32xf32>
    %c2_269 = arith.constant 2 : index
    %c0_270 = arith.constant 0 : index
    %463 = vector.load %arg41[%c2_269, %c0_270] : memref<3x32xf32, #tpu.memory_space<vmem>>, vector<1x32xf32>
    %c0_271 = arith.constant 0 : index
    %c0_272 = arith.constant 0 : index
    %464 = vector.load %arg38[%c0_271, %c0_272] : memref<32x16xf32, #tpu.memory_space<vmem>>, vector<32x16xf32>
    %cst_273 = arith.constant dense<0.000000e+00> : vector<8x16xf32>
    %465 = tpu.matmul %457, %464, %cst_273 {dimension_numbers = #tpu.dot_dimension_numbers<[1], [0], [0], [1], [0, 0, 1, 1], [], []>} : vector<8x32xf32>, vector<32x16xf32>, vector<8x16xf32> -> vector<8x16xf32>
    %466 = vector.broadcast %458 : vector<1x16xf32> to vector<8x16xf32>
    %467 = arith.addf %465, %466 : vector<8x16xf32>
    %cst_274 = arith.constant dense<0.000000e+00> : vector<8xf32>
    %468 = vector.multi_reduction <add>, %467, %cst_274 [1] : vector<8x16xf32> to vector<8xf32>
    %469 = vector.shape_cast %468 : vector<8xf32> to vector<8x1xf32>
    %cst_275 = arith.constant 1.600000e+01 : f32
    %470 = vector.broadcast %cst_275 : f32 to vector<8x1xf32>
    %471 = arith.divf %469, %470 : vector<8x1xf32>
    %472 = vector.broadcast %471 : vector<8x1xf32> to vector<8x16xf32>
    %473 = arith.subf %467, %472 : vector<8x16xf32>
    %474 = arith.mulf %473, %473 : vector<8x16xf32>
    %cst_276 = arith.constant dense<0.000000e+00> : vector<8xf32>
    %475 = vector.multi_reduction <add>, %474, %cst_276 [1] : vector<8x16xf32> to vector<8xf32>
    %476 = vector.shape_cast %475 : vector<8xf32> to vector<8x1xf32>
    %cst_277 = arith.constant 1.600000e+01 : f32
    %477 = vector.broadcast %cst_277 : f32 to vector<8x1xf32>
    %478 = arith.divf %476, %477 : vector<8x1xf32>
    %cst_278 = arith.constant 9.99999974E-6 : f32
    %479 = vector.broadcast %cst_278 : f32 to vector<8x1xf32>
    %480 = arith.addf %478, %479 : vector<8x1xf32>
    %481 = math.rsqrt %480 : vector<8x1xf32>
    %482 = vector.broadcast %481 : vector<8x1xf32> to vector<8x16xf32>
    %483 = arith.mulf %473, %482 : vector<8x16xf32>
    %484 = vector.broadcast %459 : vector<1x16xf32> to vector<8x16xf32>
    %485 = arith.mulf %483, %484 : vector<8x16xf32>
    %486 = vector.broadcast %460 : vector<1x16xf32> to vector<8x16xf32>
    %487 = arith.addf %485, %486 : vector<8x16xf32>
    %cst_279 = arith.constant 5.000000e-01 : f32
    %488 = vector.broadcast %cst_279 : f32 to vector<8x16xf32>
    %489 = arith.mulf %488, %487 : vector<8x16xf32>
    %cst_280 = arith.constant 2.000000e+00 : f32
    %490 = math.sqrt %cst_280 : f32
    %cst_281 = arith.constant 1.000000e+00 : f32
    %491 = arith.divf %cst_281, %490 : f32
    %492 = vector.broadcast %491 : f32 to vector<8x16xf32>
    %493 = arith.mulf %487, %492 : vector<8x16xf32>
    %494 = math.erf %493 : vector<8x16xf32>
    %cst_282 = arith.constant 1.000000e+00 : f32
    %495 = vector.broadcast %cst_282 : f32 to vector<8x16xf32>
    %496 = arith.addf %495, %494 : vector<8x16xf32>
    %497 = arith.mulf %489, %496 : vector<8x16xf32>
    %c0_283 = arith.constant 0 : index
    %c0_284 = arith.constant 0 : index
    %498 = vector.load %arg40[%c0_283, %c0_284] : memref<16x32xf32, #tpu.memory_space<vmem>>, vector<16x32xf32>
    %cst_285 = arith.constant dense<0.000000e+00> : vector<8x32xf32>
    %499 = tpu.matmul %497, %498, %cst_285 {dimension_numbers = #tpu.dot_dimension_numbers<[1], [0], [0], [1], [0, 0, 1, 1], [], []>} : vector<8x16xf32>, vector<16x32xf32>, vector<8x32xf32> -> vector<8x32xf32>
    %500 = vector.broadcast %461 : vector<1x32xf32> to vector<8x32xf32>
    %501 = arith.addf %499, %500 : vector<8x32xf32>
    %cst_286 = arith.constant dense<0.000000e+00> : vector<8xf32>
    %502 = vector.multi_reduction <add>, %501, %cst_286 [1] : vector<8x32xf32> to vector<8xf32>
    %503 = vector.shape_cast %502 : vector<8xf32> to vector<8x1xf32>
    %cst_287 = arith.constant 3.200000e+01 : f32
    %504 = vector.broadcast %cst_287 : f32 to vector<8x1xf32>
    %505 = arith.divf %503, %504 : vector<8x1xf32>
    %506 = vector.broadcast %505 : vector<8x1xf32> to vector<8x32xf32>
    %507 = arith.subf %501, %506 : vector<8x32xf32>
    %508 = arith.mulf %507, %507 : vector<8x32xf32>
    %cst_288 = arith.constant dense<0.000000e+00> : vector<8xf32>
    %509 = vector.multi_reduction <add>, %508, %cst_288 [1] : vector<8x32xf32> to vector<8xf32>
    %510 = vector.shape_cast %509 : vector<8xf32> to vector<8x1xf32>
    %cst_289 = arith.constant 3.200000e+01 : f32
    %511 = vector.broadcast %cst_289 : f32 to vector<8x1xf32>
    %512 = arith.divf %510, %511 : vector<8x1xf32>
    %cst_290 = arith.constant 9.99999974E-6 : f32
    %513 = vector.broadcast %cst_290 : f32 to vector<8x1xf32>
    %514 = arith.addf %512, %513 : vector<8x1xf32>
    %515 = math.rsqrt %514 : vector<8x1xf32>
    %516 = vector.broadcast %515 : vector<8x1xf32> to vector<8x32xf32>
    %517 = arith.mulf %507, %516 : vector<8x32xf32>
    %518 = vector.broadcast %462 : vector<1x32xf32> to vector<8x32xf32>
    %519 = arith.mulf %517, %518 : vector<8x32xf32>
    %520 = vector.broadcast %463 : vector<1x32xf32> to vector<8x32xf32>
    %521 = arith.addf %519, %520 : vector<8x32xf32>
    %c0_291 = arith.constant 0 : index
    %c0_292 = arith.constant 0 : index
    %522 = vector.load %arg42[%c0_291, %c0_292] : memref<8x32xf32, #tpu.memory_space<vmem>>, vector<8x32xf32>
    tpu.vector_store %arg42[%c0_291, %c0_292], %521 {strides = array<i32>} : memref<8x32xf32, #tpu.memory_space<vmem>>, vector<8x32xf32>,
    return
  }
  func.func @transform_0(%arg0: i32) -> (i32, i32) {
    %c0_i32 = arith.constant 0 : i32
    %c0_i32_0 = arith.constant 0 : i32
    %c0_i32_1 = arith.constant 0 : i32
    return %c0_i32, %c0_i32_0 : i32, i32
  }
  func.func @transform_1(%arg0: i32) -> (i32, i32) {
    %c0_i32 = arith.constant 0 : i32
    %c0_i32_0 = arith.constant 0 : i32
    return %arg0, %c0_i32 : i32, i32
  }
  func.func @transform_2(%arg0: i32) -> (i32, i32) {
    %c0_i32 = arith.constant 0 : i32
    %c0_i32_0 = arith.constant 0 : i32
    return %arg0, %c0_i32 : i32, i32
  }
  func.func @transform_3(%arg0: i32) -> (i32, i32) {
    %c0_i32 = arith.constant 0 : i32
    %c0_i32_0 = arith.constant 0 : i32
    return %arg0, %c0_i32 : i32, i32
  }
  func.func @transform_4(%arg0: i32) -> (i32, i32) {
    %c0_i32 = arith.constant 0 : i32
    %c0_i32_0 = arith.constant 0 : i32
    return %arg0, %c0_i32 : i32, i32
  }
  func.func @transform_5(%arg0: i32) -> (i32, i32) {
    %c0_i32 = arith.constant 0 : i32
    %c0_i32_0 = arith.constant 0 : i32
    return %arg0, %c0_i32 : i32, i32
  }
  func.func @transform_6(%arg0: i32) -> (i32, i32) {
    %c0_i32 = arith.constant 0 : i32
    %c0_i32_0 = arith.constant 0 : i32
    return %arg0, %c0_i32 : i32, i32
  }
  func.func @transform_7(%arg0: i32) -> (i32, i32) {
    %c0_i32 = arith.constant 0 : i32
    %c0_i32_0 = arith.constant 0 : i32
    return %arg0, %c0_i32 : i32, i32
  }
  func.func @transform_8(%arg0: i32) -> (i32, i32) {
    %c0_i32 = arith.constant 0 : i32
    %c0_i32_0 = arith.constant 0 : i32
    return %arg0, %c0_i32 : i32, i32
  }
  func.func @transform_9(%arg0: i32) -> (i32, i32) {
    %c0_i32 = arith.constant 0 : i32
    %c0_i32_0 = arith.constant 0 : i32
    return %arg0, %c0_i32 : i32, i32
  }
  func.func @transform_10(%arg0: i32) -> (i32, i32) {
    %c0_i32 = arith.constant 0 : i32
    %c0_i32_0 = arith.constant 0 : i32
    return %arg0, %c0_i32 : i32, i32
  }
  func.func @transform_11(%arg0: i32) -> (i32, i32) {
    %c0_i32 = arith.constant 0 : i32
    %c0_i32_0 = arith.constant 0 : i32
    %c0_i32_1 = arith.constant 0 : i32
    return %c0_i32, %c0_i32_0 : i32, i32
  }
  func.func @transform_12(%arg0: i32) -> (i32, i32) {
    %c0_i32 = arith.constant 0 : i32
    %c0_i32_0 = arith.constant 0 : i32
    %c0_i32_1 = arith.constant 0 : i32
    return %c0_i32, %c0_i32_0 : i32, i32
  }
  func.func @transform_13(%arg0: i32) -> (i32, i32) {
    %c0_i32 = arith.constant 0 : i32
    %c0_i32_0 = arith.constant 0 : i32
    %c0_i32_1 = arith.constant 0 : i32
    return %c0_i32, %c0_i32_0 : i32, i32
  }
  func.func @transform_14(%arg0: i32) -> (i32, i32) {
    %c0_i32 = arith.constant 0 : i32
    %c0_i32_0 = arith.constant 0 : i32
    %c0_i32_1 = arith.constant 0 : i32
    return %c0_i32, %c0_i32_0 : i32, i32
  }
  func.func @transform_15(%arg0: i32) -> (i32, i32) {
    %c0_i32 = arith.constant 0 : i32
    %c0_i32_0 = arith.constant 0 : i32
    %c0_i32_1 = arith.constant 0 : i32
    return %c0_i32, %c0_i32_0 : i32, i32
  }
  func.func @transform_16(%arg0: i32) -> (i32, i32) {
    %c0_i32 = arith.constant 0 : i32
    %c0_i32_0 = arith.constant 0 : i32
    %c0_i32_1 = arith.constant 0 : i32
    return %c0_i32, %c0_i32_0 : i32, i32
  }
  func.func @transform_17(%arg0: i32) -> (i32, i32, i32) {
    %c0_i32 = arith.constant 0 : i32
    %c0_i32_0 = arith.constant 0 : i32
    %c0_i32_1 = arith.constant 0 : i32
    %c0_i32_2 = arith.constant 0 : i32
    return %c0_i32, %c0_i32_0, %c0_i32_1 : i32, i32, i32
  }
  func.func @transform_18(%arg0: i32) -> (i32, i32) {
    %c0_i32 = arith.constant 0 : i32
    %c0_i32_0 = arith.constant 0 : i32
    %c0_i32_1 = arith.constant 0 : i32
    return %c0_i32, %c0_i32_0 : i32, i32
  }
  func.func @transform_19(%arg0: i32) -> (i32, i32) {
    %c0_i32 = arith.constant 0 : i32
    %c0_i32_0 = arith.constant 0 : i32
    %c0_i32_1 = arith.constant 0 : i32
    return %c0_i32, %c0_i32_0 : i32, i32
  }
  func.func @transform_20(%arg0: i32) -> (i32, i32) {
    %c0_i32 = arith.constant 0 : i32
    %c0_i32_0 = arith.constant 0 : i32
    %c0_i32_1 = arith.constant 0 : i32
    return %c0_i32, %c0_i32_0 : i32, i32
  }
  func.func @transform_21(%arg0: i32) -> (i32, i32, i32) {
    %c0_i32 = arith.constant 0 : i32
    %c0_i32_0 = arith.constant 0 : i32
    %c0_i32_1 = arith.constant 0 : i32
    %c0_i32_2 = arith.constant 0 : i32
    return %c0_i32, %c0_i32_0, %c0_i32_1 : i32, i32, i32
  }
  func.func @transform_22(%arg0: i32) -> (i32, i32) {
    %c0_i32 = arith.constant 0 : i32
    %c0_i32_0 = arith.constant 0 : i32
    %c0_i32_1 = arith.constant 0 : i32
    return %c0_i32, %c0_i32_0 : i32, i32
  }
  func.func @transform_23(%arg0: i32) -> (i32, i32) {
    %c0_i32 = arith.constant 0 : i32
    %c0_i32_0 = arith.constant 0 : i32
    %c0_i32_1 = arith.constant 0 : i32
    return %c0_i32, %c0_i32_0 : i32, i32
  }
  func.func @transform_24(%arg0: i32) -> (i32, i32) {
    %c0_i32 = arith.constant 0 : i32
    %c0_i32_0 = arith.constant 0 : i32
    %c0_i32_1 = arith.constant 0 : i32
    return %c0_i32, %c0_i32_0 : i32, i32
  }
  func.func @transform_25(%arg0: i32) -> (i32, i32, i32) {
    %c0_i32 = arith.constant 0 : i32
    %c0_i32_0 = arith.constant 0 : i32
    %c0_i32_1 = arith.constant 0 : i32
    %c0_i32_2 = arith.constant 0 : i32
    return %c0_i32, %c0_i32_0, %c0_i32_1 : i32, i32, i32
  }
  func.func @transform_26(%arg0: i32) -> (i32, i32) {
    %c0_i32 = arith.constant 0 : i32
    %c0_i32_0 = arith.constant 0 : i32
    %c0_i32_1 = arith.constant 0 : i32
    return %c0_i32, %c0_i32_0 : i32, i32
  }
  func.func @transform_27(%arg0: i32) -> (i32, i32) {
    %c0_i32 = arith.constant 0 : i32
    %c0_i32_0 = arith.constant 0 : i32
    %c0_i32_1 = arith.constant 0 : i32
    return %c0_i32, %c0_i32_0 : i32, i32
  }
  func.func @transform_28(%arg0: i32) -> (i32, i32) {
    %c0_i32 = arith.constant 0 : i32
    %c0_i32_0 = arith.constant 0 : i32
    %c0_i32_1 = arith.constant 0 : i32
    return %c0_i32, %c0_i32_0 : i32, i32
  }
  func.func @transform_29(%arg0: i32) -> (i32, i32, i32) {
    %c0_i32 = arith.constant 0 : i32
    %c0_i32_0 = arith.constant 0 : i32
    %c0_i32_1 = arith.constant 0 : i32
    %c0_i32_2 = arith.constant 0 : i32
    return %c0_i32, %c0_i32_0, %c0_i32_1 : i32, i32, i32
  }
  func.func @transform_30(%arg0: i32) -> (i32, i32) {
    %c0_i32 = arith.constant 0 : i32
    %c0_i32_0 = arith.constant 0 : i32
    %c0_i32_1 = arith.constant 0 : i32
    return %c0_i32, %c0_i32_0 : i32, i32
  }
  func.func @transform_31(%arg0: i32) -> (i32, i32) {
    %c0_i32 = arith.constant 0 : i32
    %c0_i32_0 = arith.constant 0 : i32
    %c0_i32_1 = arith.constant 0 : i32
    return %c0_i32, %c0_i32_0 : i32, i32
  }
  func.func @transform_32(%arg0: i32) -> (i32, i32) {
    %c0_i32 = arith.constant 0 : i32
    %c0_i32_0 = arith.constant 0 : i32
    %c0_i32_1 = arith.constant 0 : i32
    return %c0_i32, %c0_i32_0 : i32, i32
  }
  func.func @transform_33(%arg0: i32) -> (i32, i32) {
    %c0_i32 = arith.constant 0 : i32
    %c0_i32_0 = arith.constant 0 : i32
    %c0_i32_1 = arith.constant 0 : i32
    return %c0_i32, %c0_i32_0 : i32, i32
  }
  func.func @transform_34(%arg0: i32) -> (i32, i32) {
    %c0_i32 = arith.constant 0 : i32
    %c0_i32_0 = arith.constant 0 : i32
    %c0_i32_1 = arith.constant 0 : i32
    return %c0_i32, %c0_i32_0 : i32, i32
  }
  func.func @transform_35(%arg0: i32) -> (i32, i32) {
    %c0_i32 = arith.constant 0 : i32
    %c0_i32_0 = arith.constant 0 : i32
    %c0_i32_1 = arith.constant 0 : i32
    return %c0_i32, %c0_i32_0 : i32, i32
  }
  func.func @transform_36(%arg0: i32) -> (i32, i32) {
    %c0_i32 = arith.constant 0 : i32
    %c0_i32_0 = arith.constant 0 : i32
    %c0_i32_1 = arith.constant 0 : i32
    return %c0_i32, %c0_i32_0 : i32, i32
  }
  func.func @transform_37(%arg0: i32) -> (i32, i32) {
    %c0_i32 = arith.constant 0 : i32
    %c0_i32_0 = arith.constant 0 : i32
    %c0_i32_1 = arith.constant 0 : i32
    return %c0_i32, %c0_i32_0 : i32, i32
  }
  func.func @transform_38(%arg0: i32) -> (i32, i32) {
    %c0_i32 = arith.constant 0 : i32
    %c0_i32_0 = arith.constant 0 : i32
    %c0_i32_1 = arith.constant 0 : i32
    return %c0_i32, %c0_i32_0 : i32, i32
  }
  func.func @transform_39(%arg0: i32) -> (i32, i32) {
    %c0_i32 = arith.constant 0 : i32
    %c0_i32_0 = arith.constant 0 : i32
    %c0_i32_1 = arith.constant 0 : i32
    return %c0_i32, %c0_i32_0 : i32, i32
  }
  func.func @transform_40(%arg0: i32) -> (i32, i32) {
    %c0_i32 = arith.constant 0 : i32
    %c0_i32_0 = arith.constant 0 : i32
    %c0_i32_1 = arith.constant 0 : i32
    return %c0_i32, %c0_i32_0 : i32, i32
  }
  func.func @transform_41(%arg0: i32) -> (i32, i32) {
    %c0_i32 = arith.constant 0 : i32
    %c0_i32_0 = arith.constant 0 : i32
    return %arg0, %c0_i32 : i32, i32
  }
}

</mosaic_0001>

<bundles_post_ra>
// kernel: synergy_detector_forward.1
= control target key start
LH: loop header
LB: loop body
LE: loop exit
PB: predicated region body
PF: predicated region fallthrough
CT: control target
= control target key end

     0   :  { %s4651_s6 = smov 1   ;;  %s4652_s10 = smov 2   ;;  %s5296_s0 = inlined_call_operand.smem [shape: u32[42], index: -1, kind: input, shape index: {}] }
   0x1   :  { %s4704_s5 = sld [smem:[%s5296_s0]]   ;;  %s4653_s14 = smov 3  }
   0x2   :  { %s4709_s9 = sld [smem:[%s5296_s0 + %s4651_s6]]   ;;  %s4654_s18 = smov 4  }
   0x3   :  { %s4714_s13 = sld [smem:[%s5296_s0 + %s4652_s10]]   ;;  %s4655_s22 = smov 5  }
   0x4   :  { %s4719_s17 = sld [smem:[%s5296_s0 + %s4653_s14]]   ;;  %s4656_s26 = smov 6  }
   0x5   :  { %s4724_s21 = sld [smem:[%s5296_s0 + %s4654_s18]]   ;;  %s4657_s30 = smov 7  }
   0x6   :  { %s4729_s25 = sld [smem:[%s5296_s0 + %s4655_s22]]   ;;  %s4658_s4 = smov 8  }
   0x7   :  { %s4734_s29 = sld [smem:[%s5296_s0 + %s4656_s26]]   ;;  %s4659_s10 = smov 9  }
   0x8   :  { %5328 = sst [smem:[#allocation6_spill]] %s4709_s9  ;;  %s4660_s15 = smov 10  }
   0x9   :  { %s4739_s3 = sld [smem:[%s5296_s0 + %s4657_s30]]   ;;  %s4661_s20 = smov 11  }
   0xa   :  { %s4744_s8 = sld [smem:[%s5296_s0 + %s4658_s4]]   ;;  %s4662_s26 = smov 12  }
   0xb   :  { %5329 = sst [smem:[#allocation7_spill]] %s4724_s21  ;;  %s4663_s1 = smov 13  }
   0xc   :  { %5330 = sst [smem:[#allocation8_spill]] %s4729_s25  ;;  %s4664_s7 = smov 14  }
   0xd   :  { %5331 = sst [smem:[#allocation9_spill]] %s4734_s29  ;;  %s4666_s22 = smov 16  }
   0xe   :  { %s4749_s14 = sld [smem:[%s5296_s0 + %s4659_s10]]   ;;  %s4667_s28 = smov 17  }
   0xf   :  { %5332 = sst [smem:[#allocation10_spill]] %s4739_s3 }
  0x10   :  { %5333 = sst [smem:[#allocation11_spill]] %s4744_s8 }
  0x11   :  { %s4754_s19 = sld [smem:[%s5296_s0 + %s4660_s15]]   ;;  %s4665_s15 = smov 15  }
  0x12   :  { %s4759_s24 = sld [smem:[%s5296_s0 + %s4661_s20]]  }
  0x13   :  { %s4764_s30 = sld [smem:[%s5296_s0 + %s4662_s26]]  }
  0x14   :  { %5334 = sst [smem:[#allocation12_spill]] %s4749_s14 }
  0x15   :  { %s4769_s6 = sld [smem:[%s5296_s0 + %s4663_s1]]  }
  0x16   :  { %s4774_s12 = sld [smem:[%s5296_s0 + %s4664_s7]]   ;;  %s4668_s7 = smov 18  }
  0x17   :  { %5335 = sst [smem:[#allocation13_spill]] %s4754_s19 }
  0x18   :  { %s4779_s20 = sld [smem:[%s5296_s0 + %s4665_s15]]   ;;  %s4669_s15 = smov 19  }
  0x19   :  { %s4784_s27 = sld [smem:[%s5296_s0 + %s4666_s22]]   ;;  %s4670_s22 = smov 20  }
  0x1a   :  { %s4789_s4 = sld [smem:[%s5296_s0 + %s4667_s28]]   ;;  %s4671_s28 = smov 21  }
  0x1b   :  { %5336 = sst [smem:[#allocation14_spill]] %s4769_s6 }
  0x1c   :  { %5337 = sst [smem:[#allocation15_spill]] %s4774_s12 }
  0x1d   :  { %s4794_s19 = sld [smem:[%s5296_s0 + %s4668_s7]]   ;;  %s4672_s7 = smov 22  }
  0x1e   :  { %s4799_s14 = sld [smem:[%s5296_s0 + %s4669_s15]]   ;;  %s4673_s15 = smov 23  }
  0x1f   :  { %s4804_s8 = sld [smem:[%s5296_s0 + %s4670_s22]]   ;;  %s4674_s22 = smov 24  }
  0x20   :  { %5338 = sst [smem:[#allocation16_spill]] %s4789_s4 }
  0x21   :  { %s4809_s3 = sld [smem:[%s5296_s0 + %s4671_s28]]   ;;  %s4675_s28 = smov 25  }
  0x22   :  { %s4814_s29 = sld [smem:[%s5296_s0 + %s4672_s7]]   ;;  %s4676_s7 = smov 26  }
  0x23   :  { %s4819_s25 = sld [smem:[%s5296_s0 + %s4673_s15]]   ;;  %s4677_s15 = smov 27  }
  0x24   :  { %s4829_s21 = sld [smem:[%s5296_s0 + %s4675_s28]]   ;;  %s4679_s28 = smov 29  }
  0x25   :  { %5339 = sst [smem:[#allocation17_spill]] %s4804_s8 }
  0x26   :  { %s4824_s8 = sld [smem:[%s5296_s0 + %s4674_s22]]   ;;  %s4678_s22 = smov 28  }
  0x27   :  { %5340 = sst [smem:[#allocation18_spill]] %s4809_s3 }
  0x28   :  { %5341 = sst [smem:[#allocation19_spill]] %s4814_s29 }
  0x29   :  { %5342 = sst [smem:[#allocation20_spill]] %s4819_s25 }
  0x2a   :  { %5344 = sst [smem:[#allocation22_spill]] %s4829_s21 }
  0x2b   :  { %s4834_s29 = sld [smem:[%s5296_s0 + %s4676_s7]]   ;;  %s4680_s7 = smov 30  }
  0x2c   :  { %5343 = sst [smem:[#allocation21_spill]] %s4824_s8 }
  0x2d   :  { %s4839_s25 = sld [smem:[%s5296_s0 + %s4677_s15]]   ;;  %s4681_s15 = smov 31  }
  0x2e   :  { %s4844_s8 = sld [smem:[%s5296_s0 + %s4678_s22]]   ;;  %s4682_s22 = smov 32  }
  0x2f   :  { %s4849_s21 = sld [smem:[%s5296_s0 + %s4679_s28]]   ;;  %s4683_s28 = smov 33  }
  0x30   :  { %88 = sst [smem:[#allocation2]] %s4704_s5 }
  0x31   :  { %5345 = sst [smem:[#allocation23_spill]] %s4834_s29 }
  0x32   :  { %s4854_s29 = sld [smem:[%s5296_s0 + %s4680_s7]]   ;;  %s4684_s7 = smov 34  }
  0x33   :  { %5346 = sst [smem:[#allocation24_spill]] %s4839_s25 }
  0x34   :  { %5347 = sst [smem:[#allocation25_spill]] %s4844_s8 }
  0x35   :  { %5348 = sst [smem:[#allocation26_spill]] %s4849_s21 }
  0x36   :  { %s4859_s25 = sld [smem:[%s5296_s0 + %s4681_s15]]   ;;  %s4685_s15 = smov 35  }
  0x37   :  { %s4864_s8 = sld [smem:[%s5296_s0 + %s4682_s22]]   ;;  %s4686_s22 = smov 36  }
  0x38   :  { %5349 = sst [smem:[#allocation27_spill]] %s4854_s29  ;;  %s4691_s29 = smov 41  }
  0x39   :  { %s4869_s21 = sld [smem:[%s5296_s0 + %s4683_s28]]   ;;  %s4687_s28 = smov 37  }
  0x3a   :  { %s4874_s16 = sld [smem:[%s5296_s0 + %s4684_s7]]   ;;  %s4688_s7 = smov 38  }
  0x3b   :  { %s4879_s23 = sld [smem:[%s5296_s0 + %s4685_s15]]  }
  0x3c   :  { %5350 = sst [smem:[#allocation28_spill]] %s4859_s25  ;;  %s4689_s25 = smov 39  }
  0x3d   :  { %5351 = sst [smem:[#allocation29_spill]] %s4864_s8  ;;  %s4690_s8 = smov 40  }
  0x3e   :  { %s4884_s1 = sld [smem:[%s5296_s0 + %s4686_s22]]  }
  0x3f   :  { %5352 = sst [smem:[#allocation30_spill]] %s4869_s21 }
  0x40   :  { %5353 = sst [smem:[#allocation31_spill]] %s4874_s16 }
  0x41   :  { %5354 = sst [smem:[#allocation32_spill]] %s4879_s23 }
  0x42   :  { %s4889_s10 = sld [smem:[%s5296_s0 + %s4687_s28]]  }
  0x43   :  { %s4894_s21 = sld [smem:[%s5296_s0 + %s4688_s7]]  }
  0x44   :  { %5355 = sst [smem:[#allocation33_spill]] %s4884_s1 }
  0x45   :  { %s4899_s23 = sld [smem:[%s5296_s0 + %s4689_s25]]  }
  0x46   :  { %s4904_s1 = sld [smem:[%s5296_s0 + %s4690_s8]]  }
  0x48   :  { %5356 = sst [smem:[#allocation34_spill]] %s4889_s10 }
  0x49   :  { %s4909_s10 = sld [smem:[%s5296_s0 + %s4691_s29]]  }
  0x4c   :  { %5357 = sst [smem:[#allocation35_spill]] %s4904_s1 }
  0x4d   :  { %89 = vsyncpa [#allocation4], 0 }
  0x4e   :  { %91 = vsyncpa [#allocation4 + $0x1], 0  ;;  %s4912_s16 = smov 0   ;;  %s4914_s7 = smov 0  }
  0x4f   :  { %s4916_s11 = smov 0   ;;  %s4918_s25 = smov 0  }
  0x50 LB: > { %s5358_s1 = sld [smem:[#allocation35_spill]]  ;;  %s5359_s12 = sld [smem:[#allocation15_spill]]  ;;  %s4637_s16 = sphi %s4912_s16, %s5390_s16   ;;  %s4649_s25 = sphi %s4918_s25, %s5393_s25   ;;  %s4645_s11 = sphi %s4916_s11, %s5392_s11   ;;  %s4641_s7 = sphi %s4914_s7, %s5391_s7  }
  0x51   : > { %s5360_s6 = sld [smem:[#allocation14_spill]]  ;;  %s5361_s4 = sld [smem:[#allocation16_spill]] }
  0x52   : > { %s5362_s3 = sld [smem:[#allocation18_spill]]  ;;  %s4933_s0 = sadd.s32 4294967295, %s4649_s25  }
  0x53   : > { %s3904_s5 = sadd.s32 4294967294, %s4649_s25   ;;  %s4937_s15 = sadd.s32 1, %s4649_s25  }
  0x54   : > { %s1015_s18 = sadd.s32 1, %s4645_s11  ;;  %s1012_s8 = ssub.s32 %s4649_s25, %s4937_s15 }
  0x55   : > { %p1025_p0 = scmp.ne.s32.totalorder %s4645_s11, %s4641_s7  ;;  %p1013_p1 = scmp.eq.s32.totalorder %s1012_s8, 0 }
  0x56   : > { %p1026_p2 = scmp.eq.s32.totalorder %s4933_s0, 1  ;;  %p1031_p3 = scmp.ne.s32.totalorder %s4641_s7, %s4637_s16 }
  0x57   : > { %p1032_p4 = scmp.eq.s32.totalorder %s3904_s5, 1  ;;  %p3907_p7 = scmp.ge.s32.totalorder %s4649_s25, 1 }
  0x58   : > { %s4948_s22 = scalar_select %p1013_p1, %s4645_s11, %s1015_s18  }
  0x59   : > { %p4950_p5 = por %p1026_p2, %p1025_p0  ;;  %p4954_p6 = por %p1032_p4, %p1031_p3 }
  0x5a   : > { %p1213_p8 = scmp.lt.s32.totalorder %s4649_s25, 3 }
  0x5c   : > { %p1214_p9 = pnand %p3907_p7, %p1213_p8 }
  0x5d   : > { %v1392_v0 = vld [vmem:[%s4759_s24] sm:$0xff] (!%p1214_p9)  ;;  %v1393_v1 = vld [vmem:[%s4759_s24 + $0x8] sm:$0xff] (!%p1214_p9)  ;;  %v4692_v3 = vmov (!%p1214_p9), 0.0|0.0   ;;  %v1394_v6 = vld [vmem:[%s4759_s24 + $0x10] sm:$0xff] (!%p1214_p9)  ;;  %p1348_p10 = scmp.lt.s32.totalorder (!%p1214_p9), %s4933_s0, 1  ;;  %vm4693_vm0 = vmmov (!%p1214_p9), 0  }
  0x5e   : > { %1217 = sbr.rel (%p1214_p9) target bundleno = 5552 (0x15b0), region = 184  ;;  %v1505_v2 = vld [vmem:[%s5360_s6] sm:$0xff] (!%p1214_p9)  ;;  %4350 = vmatprep.subr.bf16.mxu0 (!%p1214_p9), %v4692_v3  ;;  %4359 = vmatprep.subr.bf16.mxu1 (!%p1214_p9), %v4692_v3  ;;  %v4351_v4 = vpack.c.bf16 (!%p1214_p9), %v1393_v1, %v1392_v0  ;;  %v1506_v5 = vld [vmem:[%s5360_s6 + $0x8] sm:$0xff] (!%p1214_p9)  ;;  %v1395_v7 = vld [vmem:[%s4759_s24 + $0x18] sm:$0xff] (!%p1214_p9)  ;;  %v4694_v11 = vmov (!%p1214_p9), 0.0   ;;  %s5365_s9 = sld [smem:[#allocation6_spill]] (!%p1214_p9) }
  0x5f   : > { %v4360_v8 = vpack.c.bf16 (!%p1214_p9), %v1506_v5, %v1505_v2  ;;  %v1507_v9 = vld [vmem:[%s5360_s6 + $0x10] sm:$0xff] (!%p1214_p9)  ;;  %v1508_v10 = vld [vmem:[%s5360_s6 + $0x18] sm:$0xff] (!%p1214_p9)  ;;  %4150 = vmatprep.mubr.msk.f32.mxu1 (!%p1214_p9), %vm4693_vm0, %v4694_v11  ;;  %4139 = vmatprep.mubr.msk.f32.mxu0 (!%p1214_p9), %vm4693_vm0, %v4694_v11  ;;  %v4354_v12 = vpack.c.bf16 (!%p1214_p9), %v1395_v7, %v1394_v6  ;;  %v1396_v14 = vld [vmem:[%s4759_s24 + $0x20] sm:$0xff] (!%p1214_p9)  ;;  %vm1476_vm1 = vcmask (!%p1214_p9), 261120   ;;  %vm1402_vm2 = vcmask (!%p1214_p9), 392192   ;;  %s5381_s6 = sld [smem:[#allocation21_spill]] (!%p1214_p9) }
  0x60   : > { %4352 = vmatpush3.bf16.msra.mxu0 (!%p1214_p9), %v4351_v4  ;;  %v4363_v13 = vpack.c.bf16 (!%p1214_p9), %v1508_v10, %v1507_v9  ;;  %v1397_v15 = vld [vmem:[%s4759_s24 + $0x28] sm:$0xff] (!%p1214_p9)  ;;  %v1613_v16 = vld [vmem:[%s4779_s20] sm:$0xff] (!%p1214_p9)  ;;  %v1615_v22 = vld [vmem:[%s4779_s20 + $0x10] sm:$0xff] (!%p1214_p9)  ;;  %vm1620_vm3 = vcmask (!%p1214_p9), 195584   ;;  %vm1962_vm4 = vcmask (!%p1214_p9), 48128   ;;  %vm2000_vm5 = vcmask (!%p1214_p9), 1045504  }
  0x61   : > { %4361 = vmatpush3.bf16.msra.mxu1 (!%p1214_p9), %v4360_v8  ;;  %4353 = vmatprep.subr.bf16.mxu0 (!%p1214_p9), %v4692_v3  ;;  %v1614_v17 = vld [vmem:[%s4779_s20 + $0x8] sm:$0xff] (!%p1214_p9)  ;;  %v4357_v18 = vpack.c.bf16 (!%p1214_p9), %v1397_v15, %v1396_v14  ;;  %v3923_v24 = vld [vmem:[%s5359_s12] ss:$0 sm:$0xff] (!%p1214_p9)  ;;  %v3933_v57 = vld [vmem:[%s5361_s4 + $0x30] sm:$0xff] (!%p1214_p9)  ;;  %vm2945_vm6 = vcmask (!%p1214_p9), 130048  }
  0x62   : > { %4362 = vmatprep.subr.bf16.mxu1 (!%p1214_p9), %v4692_v3  ;;  %v4366_v20 = vpack.c.bf16 (!%p1214_p9), %v1614_v17, %v1613_v16  ;;  %v3919_v28 = vld [vmem:[%s4764_s30] ss:$0 sm:$0xff] (!%p1214_p9)  ;;  %v3932_v55 = vld [vmem:[%s5361_s4 + $0x28] sm:$0xff] (!%p1214_p9)  ;;  %v3934_v58 = vld [vmem:[%s5361_s4 + $0x38] sm:$0xff] (!%p1214_p9) }
  0x63   : > { %v3927_v33 = vld [vmem:[%s4784_s27] ss:$0 sm:$0xff] (!%p1214_p9)  ;;  %v4372_v59 = vpack.c.bf16 (!%p1214_p9), %v3934_v58, %v3933_v57  ;;  %v1724_v61 = vld [vmem:[%s5361_s4 + $0x8] sm:$0xff] (!%p1214_p9)  ;;  %v1725_v63 = vld [vmem:[%s5361_s4 + $0x10] sm:$0xff] (!%p1214_p9) }
  0x64   : > { %4355 = vmatpush3.bf16.msra.mxu0 (!%p1214_p9), %v4354_v12  ;;  %v3931_v54 = vld [vmem:[%s5361_s4 + $0x20] sm:$0xff] (!%p1214_p9)  ;;  %v1726_v0 = vld [vmem:[%s5361_s4 + $0x18] sm:$0xff] (!%p1214_p9)  ;;  %v3938_v17 = vld [vmem:[%s5361_s4 + $0x48] sm:$0xff] (!%p1214_p9) }
  0x65   : > { %s1349_s28 = scalar_select %p1348_p10, %s4933_s0, 1  ;;  %4364 = vmatpush3.bf16.msra.mxu1 %v4363_v13  ;;  %4356 = vmatprep.subr.bf16.mxu0 %v4692_v3  ;;  %v4369_v56 = vpack.c.bf16 %v3932_v55, %v3931_v54  ;;  %v1723_v60 = vld [vmem:[%s5361_s4] sm:$0xff]  ;;  %v4378_v1 = vpack.c.bf16 %v1726_v0, %v1725_v63  ;;  %v2107_v55 = vld [vmem:[%s5362_s3 + $0x8] sm:$0xff]  ;;  %v2108_v57 = vld [vmem:[%s5362_s3 + $0x10] sm:$0xff] }
  0x66   : > { %4365 = vmatprep.subr.bf16.mxu1 %v4692_v3  ;;  %v4375_v62 = vpack.c.bf16 %v1724_v61, %v1723_v60  ;;  %v3925_v14 = vld [vmem:[%s5359_s12 + $0x1] ss:$0 sm:$0xff]  ;;  %v2109_v58 = vld [vmem:[%s5362_s3 + $0x18] sm:$0xff] }
  0x67   : > { %s4980_s2 = sshll.u32 %s1349_s28, 3  ;;  %v3937_v16 = vld [vmem:[%s5361_s4 + $0x40] sm:$0xff]  ;;  %s5366_s28 = sld [smem:[#allocation7_spill]] }
  0x68   : > { %s1355_s5 = scalar_lea.vmem %s4714_s13, %s4980_s2  ;;  %s1351_s18 = scalar_lea.vmem %s5365_s9, %s4980_s2  ;;  %4358 = vmatpush3.bf16.msra.mxu0 %v4357_v18  ;;  %v3926_v18 = vld [vmem:[%s5359_s12 + $0x2] ss:$0 sm:$0xff] }
  0x69   : > { %v1501_v19 = vld [vmem:[%s1355_s5] sm:$0xff]  ;;  %s1359_s8 = scalar_lea.vmem %s4719_s17, %s4980_s2  ;;  %4368 = vmatprep.subr.bf16.mxu0 %v4692_v3 }
  0x6a   : > { %4151 = vmatmul.mubr.msk.f32.vlgmr.msra.gmra.mrb[0].mxu1 %vm1476_vm1, %v1501_v19  ;;  %v1388_v21 = vld [vmem:[%s1351_s18] sm:$0xff]  ;;  %s5367_s18 = sld [smem:[#allocation8_spill]] }
  0x6b   : > { %4367 = vmatpush3.bf16.msra.mxu1 %v4366_v20  ;;  %4159 = vmatprep.mubr.msk.f32.mxu1 %vm4693_vm0, %v4694_v11  ;;  %v1609_v23 = vld [vmem:[%s1359_s8] sm:$0xff]  ;;  %s5368_s8 = sld [smem:[#allocation9_spill]] }
  0x6c   : > { %4157 = vmatprep.subr.mxu1 %v4694_v11  ;;  %4140 = vmatmul.mubr.msk.f32.vlgmr.msra.gmra.mrb[0].mxu0 %vm1402_vm2, %v1388_v21  ;;  %v4381_v21 = vpack.c.bf16 %v3938_v17, %v3937_v16  ;;  %v2106_v54 = vld [vmem:[%s5362_s3] sm:$0xff]  ;;  %v3952_v16 = vld [vmem:[%s5362_s3 + $0x30] sm:$0xff]  ;;  %v3953_v17 = vld [vmem:[%s5362_s3 + $0x38] sm:$0xff] }
  0x6d   : > { %4170 = vmatprep.mubr.msk.f32.mxu0 %vm4693_vm0, %v4694_v11  ;;  %4370 = vmatpush3.bf16.msra.mxu0 %v4369_v56  ;;  %v4393_v56 = vpack.c.bf16 %v2107_v55, %v2106_v54  ;;  %s1363_s5 = scalar_lea.vmem %s5366_s28, %s4980_s2 }
  0x6e   : > { %4371 = vmatprep.subr.bf16.mxu0 %v4692_v3  ;;  %v2097_v60 = vld [vmem:[%s1363_s5] sm:$0xff]  ;;  %s5369_s5 = sld [smem:[#allocation19_spill]] }
  0x6f   : > { %4158 = vmatpush3.msra.mxu1 %v1615_v22  ;;  %v3921_v22 = vld [vmem:[%s4764_s30 + $0x1] ss:$0 sm:$0xff] }
  0x70   : > { %4160 = vmatmul.mubr.msk.f32.vlgmr.msra.gmra.mrb[2].mxu1 %vm1620_vm3, %v1609_v23  ;;  %4374 = vmatprep.subr.bf16.mxu1 %v4692_v3  ;;  %s1367_s28 = scalar_lea.vmem %s5367_s18, %s4980_s2 }
  0x71   : > { %4181 = vmatprep.mubr.msk.f32.mxu1 %vm4693_vm0, %v4694_v11  ;;  %4373 = vmatpush3.bf16.msra.mxu0 %v4372_v59  ;;  %v4396_v59 = vpack.c.bf16 %v2109_v58, %v2108_v57  ;;  %s1371_s18 = scalar_lea.vmem %s5368_s8, %s4980_s2  ;;  %s5371_s8 = sld [smem:[#allocation22_spill]] }
  0x72   : > { %4376 = vmatpush3.bf16.msra.mxu1 %v4375_v62  ;;  %4380 = vmatprep.subr.bf16.mxu0 %v4692_v3 }
  0x73   : > { %4377 = vmatprep.subr.bf16.mxu1 %v4692_v3 }
  0x74   : > { %v3962_v57 = vld [vmem:[%s5369_s5 + $0x1] ss:$0 sm:$0xff] }
  0x76   : > { %4379 = vmatpush3.bf16.msra.mxu1 %v4378_v1  ;;  %v3943_v1 = vld [vmem:[%s4794_s19 + $0x1] ss:$0 sm:$0xff] }
  0x77   : > { %4195 = vmatprep.subr.mxu1 %v4694_v11 }
 0x13d   : > { %v1582_v25 = vpop.f32.mrb[0].mxu1 }
 0x13e   : > { %v1583_v26 = vadd.f32 %v3923_v24, %v1582_v25  ;;  %v4152_v27 = vpop.f32.mrb[1].mxu1  ;;  %v3939_v25 = vld [vmem:[%s5361_s4 + $0x50] sm:$0xff] }
 0x13f   : > { %v1472_v30 = vpop.f32.mrb[0].mxu0 }
 0x140   : > { %v1586_v29 = vsel %vm1476_vm1, %v1583_v26, 0.0  ;;  %v1473_v31 = vadd.f32 %v3919_v28, %v1472_v30  ;;  %v4141_v32 = vpop.f32.mrb[1].mxu0  ;;  %v3922_v28 = vld [vmem:[%s4764_s30 + $0x2] ss:$0 sm:$0xff] }
 0x141   : > { %1587 = vadd.xlane.f32.xlu0 %v1586_v29  ;;  %v3929_v29 = vld [vmem:[%s4784_s27 + $0x1] ss:$0 sm:$0xff] }
 0x142   : > { %v1477_v35 = vsel %vm1476_vm1, %v1473_v31, 0.0 }
 0x143   : > { %v1690_v34 = vpop.f32.mrb[2].mxu1 }
 0x144   : > { %v1691_v36 = vadd.f32 %v3927_v33, %v1690_v34  ;;  %v4161_v37 = vpop.f32.mrb[3].mxu1  ;;  %v3930_v33 = vld [vmem:[%s4784_s27 + $0x2] ss:$0 sm:$0xff] }
 0x145   : > { %1478 = vadd.xlane.f32.xlu0 %v1477_v35 }
 0x146   : > { %v1694_v38 = vsel %vm1476_vm1, %v1691_v36, 0.0 }
 0x147   : > { %1695 = vadd.xlane.f32.xlu1 %v1694_v38 }
 0x1ce   : > { %v1588_v39 = vpop.xlane.xlu0 %1587 }
 0x1cf   : > { %v1589_v40 = vmul.f32 0.03125, %v1588_v39 }
 0x1d1   : > { %v1590_v41 = vsub.f32 %v1583_v26, %v1589_v40  ;;  %v3940_v26 = vld [vmem:[%s5361_s4 + $0x58] sm:$0xff]  ;;  %s5375_s4 = sld [smem:[#allocation23_spill]] }
 0x1d2   : > { %v1479_v42 = vpop.xlane.xlu0 %1478  ;;  %v4384_v32 = vpack.c.bf16 %v3940_v26, %v3939_v25  ;;  %v2099_v26 = vld [vmem:[%s1371_s18] sm:$0xff]  ;;  %s5372_s18 = sld [smem:[#allocation10_spill]] }
 0x1d3   : > { %v1481_v43 = vmul.f32 0.03125, %v1479_v42  ;;  %v1591_v44 = vmul.f32 %v1590_v41, %v1590_v41 }
 0x1d4   : > { %v1696_v45 = vpop.xlane.xlu1 %1695 }
 0x1d5   : > { %v1482_v46 = vsub.f32 %v1473_v31, %v1481_v43  ;;  %v1697_v47 = vmul.f32 0.03125, %v1696_v45  ;;  %v1592_v48 = vsel %vm1476_vm1, %v1591_v44, 0.0  ;;  %v3942_v43 = vld [vmem:[%s4794_s19] ss:$0 sm:$0xff] }
 0x1d6   : > { %1593 = vadd.xlane.f32.xlu1 %v1592_v48 }
 0x1d7   : > { %v1698_v49 = vsub.f32 %v1691_v36, %v1697_v47  ;;  %v1483_v50 = vmul.f32 %v1482_v46, %v1482_v46 }
 0x1d9   : > { %v1484_v51 = vsel %vm1476_vm1, %v1483_v50, 0.0  ;;  %v1699_v52 = vmul.f32 %v1698_v49, %v1698_v49 }
 0x1da   : > { %1485 = vadd.xlane.f32.xlu0 %v1484_v51 }
 0x1db   : > { %v1700_v53 = vsel %vm1476_vm1, %v1699_v52, 0.0 }
 0x1dc   : > { %1701 = vadd.xlane.f32.xlu1 %v1700_v53  ;;  %v1992_v53 = vld [vmem:[%s4799_s14] sm:$0x3f] }
 0x263   : > { %v1594_v2 = vpop.xlane.xlu1 %1593 }
 0x264   : > { %v1595_v4 = vmul.f32 0.03125, %v1594_v2 }
 0x266   : > { %v1596_v5 = vadd.f32 1e-05, %v1595_v4  ;;  %v3944_v4 = vld [vmem:[%s4794_s19 + $0x2] ss:$0 sm:$0xff] }
 0x267   : > { %v1486_v6 = vpop.xlane.xlu0 %1485 }
 0x268   : > { %4541 = vrsqrt.f32 %v1596_v5  ;;  %v1487_v7 = vmul.f32 0.03125, %v1486_v6 }
 0x269   : > { %v1702_v8 = vpop.xlane.xlu1 %1701 }
 0x26a   : > { %v1488_v9 = vadd.f32 1e-05, %v1487_v7  ;;  %v1703_v10 = vmul.f32 0.03125, %v1702_v8  ;;  %v3950_v8 = vld [vmem:[%s5362_s3 + $0x20] sm:$0xff] }
 0x26c   : > { %4543 = vrsqrt.f32 %v1488_v9  ;;  %v1704_v12 = vadd.f32 1e-05, %v1703_v10  ;;  %v3951_v9 = vld [vmem:[%s5362_s3 + $0x28] sm:$0xff] }
 0x26e   : > { %4545 = vrsqrt.f32 %v1704_v12 }
 0x272   : > { %v4542_v13 = vpop.eup %4541 }
 0x273   : > { %v1598_v15 = vmul.f32 %v4542_v13, %v1590_v41 }
 0x275   : > { %v1603_v19 = vmul.f32 %v3925_v14, %v1598_v15  ;;  %v4387_v14 = vpack.c.bf16 %v3951_v9, %v3950_v8  ;;  %v3972_v8 = vld [vmem:[%s5371_s8 + $0x38] sm:$0xff] }
 0x276   : > { %v4544_v20 = vpop.eup %4543 }
 0x277   : > { %v1490_v23 = vmul.f32 %v4544_v20, %v1482_v46  ;;  %v1608_v24 = vadd.f32 %v3926_v18, %v1603_v19  ;;  %v4390_v18 = vpack.c.bf16 %v3953_v17, %v3952_v16  ;;  %v3956_v19 = vld [vmem:[%s5362_s3 + $0x40] sm:$0xff]  ;;  %v3957_v20 = vld [vmem:[%s5362_s3 + $0x48] sm:$0xff]  ;;  %v3978_v16 = vld [vmem:[%s5371_s8 + $0x58] sm:$0xff] }
 0x278   : > { %v4546_v27 = vpop.eup %4545 }
 0x279   : > { %v1706_v30 = vmul.f32 %v4546_v27, %v1698_v49  ;;  %4171 = vmatmul.mubr.msk.f32.vlgmr.msra.gmra.mrb[2].mxu0 %vm1476_vm1, %v1608_v24  ;;  %v1495_v31 = vmul.f32 %v3921_v22, %v1490_v23  ;;  %v4399_v22 = vpack.c.bf16 %v3957_v20, %v3956_v19  ;;  %v3958_v23 = vld [vmem:[%s5362_s3 + $0x50] sm:$0xff]  ;;  %v3959_v24 = vld [vmem:[%s5362_s3 + $0x58] sm:$0xff]  ;;  %s1375_s3 = scalar_lea.vmem %s5372_s18, %s4980_s2 }
 0x27a   : > { %4382 = vmatpush3.bf16.msra.mxu0 %v4381_v21  ;;  %4192 = vmatprep.mubr.msk.f32.mxu0 %vm4693_vm0, %v4694_v11  ;;  %v2098_v21 = vld [vmem:[%s1367_s28] sm:$0xff]  ;;  %v4402_v25 = vpack.c.bf16 %v3959_v24, %v3958_v23  ;;  %s5370_s28 = sld [smem:[#allocation20_spill]] }
 0x27b   : > { %4383 = vmatprep.subr.bf16.mxu0 %v4692_v3  ;;  %v1500_v34 = vadd.f32 %v3922_v28, %v1495_v31  ;;  %v1711_v35 = vmul.f32 %v3929_v29, %v1706_v30 }
 0x27d   : > { %4182 = vmatmul.mubr.msk.f32.vlgmr.msra.gmra.mrb[4].mxu1 %vm1476_vm1, %v1500_v34  ;;  %v1716_v36 = vadd.f32 %v3930_v33, %v1711_v35  ;;  %v3961_v35 = vld [vmem:[%s5369_s5] ss:$0 sm:$0xff] }
 0x27e   : > { %4385 = vmatpush3.bf16.msra.mxu0 %v4384_v32  ;;  %4197 = vmatprep.mubr.msk.f32.mxu1 %vm4693_vm0, %v4694_v11 }
 0x27f   : > { %4392 = vmatprep.subr.bf16.mxu0 %v4692_v3  ;;  %4196 = vmatpush3.msk.msra.mxu1 %vm2000_vm5, %v1992_v53 }
 0x280   : > { %4386 = vmatprep.subr.bf16.mxu1 %v4692_v3 }
 0x281   : > { %4193 = vmatmul.mubr.msk.f32.vlgmr.msra.gmra.mrb[4].mxu0 %vm1476_vm1, %v1716_v36 }
 0x282   : > { %4219 = vmatprep.mubr.msk.f32.mxu0 %vm4693_vm0, %v4694_v11  ;;  %4394 = vmatpush3.bf16.msra.mxu0 %v4393_v56 }
 0x283   : > { %4395 = vmatprep.subr.bf16.mxu0 %v4692_v3 }
 0x286   : > { %4397 = vmatpush3.bf16.msra.mxu0 %v4396_v59  ;;  %v3963_v59 = vld [vmem:[%s5369_s5 + $0x2] ss:$0 sm:$0xff]  ;;  %s5380_s5 = sld [smem:[#allocation25_spill]] }
 0x287   : > { %4233 = vmatprep.subr.mxu0 %v4694_v11 }
 0x289   : > { %4220 = vmatmul.mubr.msk.f32.vlgmr.msra.gmra.mrb[6].mxu0 %vm1476_vm1, %v2097_v60 }
 0x28a   : > { %4235 = vmatprep.mubr.msk.f32.mxu0 %vm4693_vm0, %v4694_v11 }
 0x34c   : > { %v1801_v37 = vpop.f32.mrb[2].mxu0 }
 0x34d   : > { %v4172_v38 = vpop.f32.mrb[3].mxu0 }
 0x350   : > { %v1874_v39 = vpop.f32.mrb[4].mxu1 }
 0x351   : > { %v1875_v40 = vadd.f32 %v1874_v39, %v1801_v37  ;;  %v4183_v41 = vpop.f32.mrb[5].mxu1 }
 0x354   : > { %v1952_v42 = vpop.f32.mrb[4].mxu0 }
 0x355   : > { %v1956_v44 = vadd.f32 %v1952_v42, %v1875_v40  ;;  %v4194_v45 = vpop.f32.mrb[5].mxu0 }
 0x356   : > { %v2373_v45 = vld [vmem:[%s5370_s28] sm:$0x3f]  ;;  %s5374_s28 = sld [smem:[#allocation12_spill]] }
 0x357   : > { %v1961_v46 = vadd.f32 %v3942_v43, %v1956_v44  ;;  %4234 = vmatpush3.msk.msra.mxu0 %vm2000_vm5, %v2373_v45  ;;  %v3982_v45 = vld [vmem:[%s5375_s4 + $0x2] ss:$0 sm:$0xff] }
 0x358   : > { %4404 = vmatprep.subr.bf16.mxu0 %v4692_v3 }
 0x359   : > { %v1963_v47 = vsel %vm1962_vm4, %v1961_v46, 0.0 }
 0x35a   : > { %1964 = vadd.xlane.f32.xlu0 %v1963_v47  ;;  %v2487_v47 = vld [vmem:[%s5371_s8 + $0x8] sm:$0xff] }
 0x35c   : > { %v2257_v27 = vpop.f32.mrb[6].mxu0 }
 0x35d   : > { %v4221_v28 = vpop.f32.mrb[7].mxu0 }
 0x3e7   : > { %v1965_v48 = vpop.xlane.xlu0 %1964 }
 0x3e8   : > { %v1967_v49 = vmul.f32 0.16666667, %v1965_v48 }
 0x3ea   : > { %v1968_v50 = vsub.f32 %v1961_v46, %v1967_v49  ;;  %v2486_v46 = vld [vmem:[%s5371_s8] sm:$0xff]  ;;  %v2488_v49 = vld [vmem:[%s5371_s8 + $0x10] sm:$0xff] }
 0x3eb   : > { %v4411_v48 = vpack.c.bf16 %v2487_v47, %v2486_v46 }
 0x3ec   : > { %v1969_v51 = vmul.f32 %v1968_v50, %v1968_v50 }
 0x3ee   : > { %v1970_v52 = vsel %vm1962_vm4, %v1969_v51, 0.0 }
 0x3ef   : > { %1971 = vadd.xlane.f32.xlu1 %v1970_v52  ;;  %v2477_v52 = vld [vmem:[%s1375_s3] sm:$0xff]  ;;  %s5373_s3 = sld [smem:[#allocation11_spill]] }
 0x3f5   : > { %s1379_s18 = scalar_lea.vmem %s5373_s3, %s4980_s2  ;;  %s1383_s3 = scalar_lea.vmem %s5374_s28, %s4980_s2 }
 0x3f6   : > { %s5377_s28 = sld [smem:[#allocation30_spill]] }
 0x47c   : > { %v1972_v61 = vpop.xlane.xlu1 %1971 }
 0x47d   : > { %v1973_v62 = vmul.f32 0.16666667, %v1972_v61 }
 0x47f   : > { %v1974_v63 = vadd.f32 1e-05, %v1973_v62 }
 0x481   : > { %4547 = vrsqrt.f32 %v1974_v63  ;;  %v3969_v63 = vld [vmem:[%s5371_s8 + $0x20] sm:$0xff] }
 0x48b   : > { %v4548_v0 = vpop.eup %4547 }
 0x48c   : > { %v1976_v2 = vmul.f32 %v4548_v0, %v1968_v50  ;;  %v2489_v50 = vld [vmem:[%s5371_s8 + $0x18] sm:$0xff]  ;;  %v3970_v0 = vld [vmem:[%s5371_s8 + $0x28] sm:$0xff] }
 0x48d   : > { %v4414_v51 = vpack.c.bf16 %v2489_v50, %v2488_v49  ;;  %v2864_v49 = vld [vmem:[%s5377_s28] sm:$0xff]  ;;  %v2865_v50 = vld [vmem:[%s5377_s28 + $0x8] sm:$0xff] }
 0x48e   : > { %v1981_v5 = vmul.f32 %v3943_v1, %v1976_v2 }
 0x490   : > { %v1986_v6 = vadd.f32 %v3944_v4, %v1981_v5  ;;  %v4405_v5 = vpack.c.bf16 %v3970_v0, %v3969_v63  ;;  %v3983_v63 = vld [vmem:[%s5380_s5] ss:$0 sm:$0xff] }
 0x492   : > { %v1988_v7 = vmul.f32 0.70710677, %v1986_v6  ;;  %v1987_v12 = vmul.f32 0.5, %v1986_v6 }
 0x494   : > { %4549 = verf.f32 %v1988_v7  ;;  %v3971_v7 = vld [vmem:[%s5371_s8 + $0x30] sm:$0xff] }
 0x495   : > { %v4408_v9 = vpack.c.bf16 %v3972_v8, %v3971_v7 }
 0x49e   : > { %v4550_v10 = vpop.eup %4549 }
 0x49f   : > { %v1990_v13 = vadd.f32 1.0, %v4550_v10  ;;  %v3975_v10 = vld [vmem:[%s5371_s8 + $0x40] sm:$0xff] }
 0x4a1   : > { %v1991_v15 = vmul.f32 %v1990_v13, %v1987_v12  ;;  %v3976_v12 = vld [vmem:[%s5371_s8 + $0x48] sm:$0xff]  ;;  %v2478_v13 = vld [vmem:[%s1379_s18] sm:$0xff]  ;;  %s5376_s18 = sld [smem:[#allocation24_spill]] }
 0x4a3   : > { %4198 = vmatmul.mubr.msk.f32.vlgmr.msra.gmra.mrb[6].mxu1 %vm1962_vm4, %v1991_v15  ;;  %v3977_v15 = vld [vmem:[%s5371_s8 + $0x50] sm:$0xff] }
 0x4a4   : > { %4388 = vmatpush3.bf16.msra.mxu1 %v4387_v14  ;;  %4208 = vmatprep.mubr.msk.f32.mxu1 %vm4693_vm0, %v4694_v11  ;;  %v4417_v14 = vpack.c.bf16 %v3976_v12, %v3975_v10  ;;  %v4420_v17 = vpack.c.bf16 %v3978_v16, %v3977_v15  ;;  %v3964_v10 = vld [vmem:[%s5381_s6] ss:$0 sm:$0xff] }
 0x4a5   : > { %4389 = vmatprep.subr.bf16.mxu1 %v4692_v3 }
 0x4a8   : > { %4391 = vmatpush3.bf16.msra.mxu1 %v4390_v18  ;;  %v2479_v18 = vld [vmem:[%s1383_s3] sm:$0xff]  ;;  %s5378_s3 = sld [smem:[#allocation13_spill]] }
 0x4a9   : > { %4398 = vmatprep.subr.bf16.mxu1 %v4692_v3 }
 0x4ab   : > { %4209 = vmatmul.mubr.msk.f32.vlgmr.msra.gmra.mrb[8].mxu1 %vm1476_vm1, %v2098_v21 }
 0x4ac   : > { %4400 = vmatpush3.bf16.msra.mxu1 %v4399_v22  ;;  %4230 = vmatprep.mubr.msk.f32.mxu1 %vm4693_vm0, %v4694_v11 }
 0x4ad   : > { %4401 = vmatprep.subr.bf16.mxu1 %v4692_v3 }
 0x4b0   : > { %4403 = vmatpush3.bf16.msra.mxu1 %v4402_v25 }
 0x4b1   : > { %4410 = vmatprep.subr.bf16.mxu1 %v4692_v3 }
 0x4b3   : > { %4231 = vmatmul.mubr.msk.f32.vlgmr.msra.gmra.mrb[10].mxu1 %vm1476_vm1, %v2099_v26 }
 0x4b4   : > { %4257 = vmatprep.mubr.msk.f32.mxu1 %vm4693_vm0, %v4694_v11  ;;  %4412 = vmatpush3.bf16.msra.mxu1 %v4411_v48 }
 0x4b5   : > { %4413 = vmatprep.subr.bf16.mxu1 %v4692_v3 }
 0x4b8   : > { %4415 = vmatpush3.bf16.msra.mxu1 %v4414_v51 }
 0x4b9   : > { %4271 = vmatprep.subr.mxu1 %v4694_v11 }
 0x4bb   : > { %4258 = vmatmul.mubr.msk.f32.vlgmr.msra.gmra.mrb[12].mxu1 %vm1476_vm1, %v2477_v52 }
 0x4bc   : > { %4273 = vmatprep.mubr.msk.f32.mxu1 %vm4693_vm0, %v4694_v11 }
 0x576   : > { %v5089_v29 = vpop.f32.mrb[6].mxu1 }
 0x577   : > { %v4199_v30 = vpop.f32.mrb[7].mxu1 }
 0x57e   : > { %v2184_v31 = vpop.f32.mrb[8].mxu1 }
 0x57f   : > { %v4210_v32 = vpop.f32.mrb[9].mxu1  ;;  %v2258_v33 = vadd.f32 %v2257_v27, %v2184_v31  ;;  %v3980_v27 = vld [vmem:[%s5375_s4] ss:$0 sm:$0xff] }
 0x586   : > { %v2335_v34 = vpop.f32.mrb[10].mxu1 }
 0x587   : > { %v2339_v36 = vadd.f32 %v2335_v34, %v2258_v33  ;;  %v4232_v37 = vpop.f32.mrb[11].mxu1 }
 0x589   : > { %v2344_v38 = vadd.f32 %v3961_v35, %v2339_v36 }
 0x58b   : > { %v2345_v39 = vsel %vm1962_vm4, %v2344_v38, 0.0 }
 0x58c   : > { %2346 = vadd.xlane.f32.xlu0 %v2345_v39 }
 0x58e   : > { %v2637_v19 = vpop.f32.mrb[12].mxu1 }
 0x58f   : > { %v4259_v20 = vpop.f32.mrb[13].mxu1 }
 0x619   : > { %v2347_v40 = vpop.xlane.xlu0 %2346 }
 0x61a   : > { %v2348_v41 = vmul.f32 0.16666667, %v2347_v40 }
 0x61c   : > { %v2349_v42 = vsub.f32 %v2344_v38, %v2348_v41  ;;  %v2753_v38 = vld [vmem:[%s5376_s18] sm:$0x3f]  ;;  %s5379_s18 = sld [smem:[#allocation31_spill]] }
 0x61d   : > { %4272 = vmatpush3.msk.msra.mxu1 %vm2000_vm5, %v2753_v38 }
 0x61e   : > { %v2350_v43 = vmul.f32 %v2349_v42, %v2349_v42  ;;  %4422 = vmatprep.subr.bf16.mxu1 %v4692_v3 }
 0x620   : > { %v2351_v44 = vsel %vm1962_vm4, %v2350_v43, 0.0  ;;  %v3981_v43 = vld [vmem:[%s5375_s4 + $0x1] ss:$0 sm:$0xff]  ;;  %s1387_s4 = scalar_lea.vmem %s5378_s3, %s4980_s2  ;;  %s5383_s2 = sld [smem:[#allocation26_spill]] }
 0x621   : > { %2352 = vadd.xlane.f32.xlu1 %v2351_v44  ;;  %s5384_s3 = sld [smem:[#allocation33_spill]] }
 0x6ae   : > { %v2353_v53 = vpop.xlane.xlu1 %2352 }
 0x6af   : > { %v2354_v54 = vmul.f32 0.16666667, %v2353_v53 }
 0x6b1   : > { %v2355_v55 = vadd.f32 1e-05, %v2354_v54  ;;  %v4423_v54 = vpack.c.bf16 %v2865_v50, %v2864_v49  ;;  %v3999_v49 = vld [vmem:[%s5383_s2 + $0x38] sm:$0xff]  ;;  %v3986_v50 = vld [vmem:[%s5380_s5 + $0x1] ss:$0 sm:$0xff] }
 0x6b3   : > { %4551 = vrsqrt.f32 %v2355_v55 }
 0x6bd   : > { %v4552_v56 = vpop.eup %4551 }
 0x6be   : > { %v2357_v58 = vmul.f32 %v4552_v56, %v2349_v42  ;;  %v2866_v56 = vld [vmem:[%s5377_s28 + $0x10] sm:$0xff] }
 0x6c0   : > { %v2362_v60 = vmul.f32 %v3962_v57, %v2357_v58  ;;  %v2867_v57 = vld [vmem:[%s5377_s28 + $0x18] sm:$0xff] }
 0x6c1   : > { %v4426_v58 = vpack.c.bf16 %v2867_v57, %v2866_v56  ;;  %v3992_v56 = vld [vmem:[%s5384_s3] ss:$0 sm:$0xff] }
 0x6c2   : > { %v2367_v61 = vadd.f32 %v3963_v59, %v2362_v60  ;;  %v2857_v59 = vld [vmem:[%s1387_s4] sm:$0xff]  ;;  %s5382_s4 = sld [smem:[#allocation32_spill]] }
 0x6c4   : > { %v2369_v62 = vmul.f32 0.70710677, %v2367_v61  ;;  %v2368_v2 = vmul.f32 0.5, %v2367_v61 }
 0x6c6   : > { %4553 = verf.f32 %v2369_v62  ;;  %v3988_v62 = vld [vmem:[%s5379_s18] ss:$0 sm:$0xff] }
 0x6d0   : > { %v4554_v1 = vpop.eup %4553 }
 0x6d1   : > { %v2371_v4 = vadd.f32 1.0, %v4554_v1 }
 0x6d3   : > { %v2372_v6 = vmul.f32 %v2371_v4, %v2368_v2 }
 0x6d5   : > { %4236 = vmatmul.mubr.msk.f32.vlgmr.msra.gmra.mrb[8].mxu0 %vm1962_vm4, %v2372_v6 }
 0x6d6   : > { %4406 = vmatpush3.bf16.msra.mxu0 %v4405_v5  ;;  %4246 = vmatprep.mubr.msk.f32.mxu0 %vm4693_vm0, %v4694_v11 }
 0x6d7   : > { %4407 = vmatprep.subr.bf16.mxu0 %v4692_v3 }
 0x6da   : > { %4409 = vmatpush3.bf16.msra.mxu0 %v4408_v9 }
 0x6db   : > { %4416 = vmatprep.subr.bf16.mxu0 %v4692_v3 }
 0x6dd   : > { %4247 = vmatmul.mubr.msk.f32.vlgmr.msra.gmra.mrb[10].mxu0 %vm1476_vm1, %v2478_v13 }
 0x6de   : > { %4418 = vmatpush3.bf16.msra.mxu0 %v4417_v14  ;;  %4268 = vmatprep.mubr.msk.f32.mxu0 %vm4693_vm0, %v4694_v11 }
 0x6df   : > { %4419 = vmatprep.subr.bf16.mxu0 %v4692_v3 }
 0x6e2   : > { %4421 = vmatpush3.bf16.msra.mxu0 %v4420_v17 }
 0x6e3   : > { %4428 = vmatprep.subr.bf16.mxu0 %v4692_v3 }
 0x6e5   : > { %4269 = vmatmul.mubr.msk.f32.vlgmr.msra.gmra.mrb[12].mxu0 %vm1476_vm1, %v2479_v18 }
 0x6e6   : > { %4291 = vmatprep.mubr.msk.f32.mxu0 %vm4693_vm0, %v4694_v11 }
 0x7a8   : > { %v5135_v21 = vpop.f32.mrb[8].mxu0 }
 0x7a9   : > { %v4237_v22 = vpop.f32.mrb[9].mxu0  ;;  %v2451_v15 = vadd.f32 %v3964_v10, %v5135_v21 }
 0x7aa   : > { %v2975_v22 = vld [vmem:[%s5382_s4] sm:$0xff] }
 0x7ab   : > { %v2454_v18 = vsel %vm1476_vm1, %v2451_v15, 0.0 }
 0x7b0   : > { %v2564_v23 = vpop.f32.mrb[10].mxu0 }
 0x7b1   : > { %v4248_v24 = vpop.f32.mrb[11].mxu0  ;;  %v2638_v25 = vadd.f32 %v2637_v19, %v2564_v23  ;;  %v2976_v23 = vld [vmem:[%s5382_s4 + $0x8] sm:$0xff]  ;;  %s5385_s4 = sld [smem:[#allocation27_spill]] }
 0x7b2   : > { %v4429_v24 = vpack.c.bf16 %v2976_v23, %v2975_v22  ;;  %v3968_v22 = vld [vmem:[%s5381_s6 + $0x2] ss:$0 sm:$0xff] }
 0x7b4   : > { %4430 = vmatpush3.bf16.msra.mxu0 %v4429_v24 }
 0x7b5   : > { %4431 = vmatprep.subr.bf16.mxu0 %v4692_v3 }
 0x7b8   : > { %v2715_v26 = vpop.f32.mrb[12].mxu0 }
 0x7b9   : > { %v2719_v28 = vadd.f32 %v2715_v26, %v2638_v25  ;;  %v4270_v30 = vpop.f32.mrb[13].mxu0 }
 0x7bb   : > { %v2724_v31 = vadd.f32 %v3980_v27, %v2719_v28 }
 0x7bd   : > { %v2725_v32 = vsel %vm1962_vm4, %v2724_v31, 0.0 }
 0x7be   : > { %2726 = vadd.xlane.f32.xlu0 %v2725_v32 }
 0x84b   : > { %v2727_v33 = vpop.xlane.xlu0 %2726 }
 0x84c   : > { %v2728_v34 = vmul.f32 0.16666667, %v2727_v33 }
 0x84e   : > { %v2729_v35 = vsub.f32 %v2724_v31, %v2728_v34  ;;  %v3990_v31 = vld [vmem:[%s5379_s18 + $0x1] ss:$0 sm:$0xff]  ;;  %v3991_v34 = vld [vmem:[%s5379_s18 + $0x2] ss:$0 sm:$0xff] }
 0x850   : > { %v2730_v36 = vmul.f32 %v2729_v35, %v2729_v35 }
 0x852   : > { %v2731_v37 = vsel %vm1962_vm4, %v2730_v36, 0.0 }
 0x853   : > { %2732 = vadd.xlane.f32.xlu1 %v2731_v37 }
 0x8e0   : > { %v2733_v39 = vpop.xlane.xlu1 %2732 }
 0x8e1   : > { %v2734_v40 = vmul.f32 0.16666667, %v2733_v39 }
 0x8e3   : > { %v2735_v41 = vadd.f32 1e-05, %v2734_v40  ;;  %v3996_v40 = vld [vmem:[%s5383_s2 + $0x20] sm:$0xff] }
 0x8e5   : > { %4555 = vrsqrt.f32 %v2735_v41  ;;  %v3997_v41 = vld [vmem:[%s5383_s2 + $0x28] sm:$0xff] }
 0x8ef   : > { %v4556_v42 = vpop.eup %4555 }
 0x8f0   : > { %v2737_v44 = vmul.f32 %v4556_v42, %v2729_v35 }
 0x8f2   : > { %v2742_v46 = vmul.f32 %v3981_v43, %v2737_v44 }
 0x8f4   : > { %v2747_v47 = vadd.f32 %v3982_v45, %v2742_v46  ;;  %v4432_v45 = vpack.c.bf16 %v3997_v41, %v3996_v40 }
 0x8f6   : > { %v2749_v48 = vmul.f32 0.70710677, %v2747_v47  ;;  %v2748_v52 = vmul.f32 0.5, %v2747_v47 }
 0x8f8   : > { %4557 = verf.f32 %v2749_v48  ;;  %v3998_v48 = vld [vmem:[%s5383_s2 + $0x30] sm:$0xff] }
 0x902   : > { %v4558_v51 = vpop.eup %4557 }
 0x903   : > { %v2751_v53 = vadd.f32 1.0, %v4558_v51  ;;  %v4435_v51 = vpack.c.bf16 %v3999_v49, %v3998_v48 }
 0x905   : > { %v2752_v55 = vmul.f32 %v2751_v53, %v2748_v52  ;;  %v3987_v53 = vld [vmem:[%s5380_s5 + $0x2] ss:$0 sm:$0xff]  ;;  %s5386_s5 = sld [smem:[#allocation17_spill]] }
 0x907   : > { %4274 = vmatmul.mubr.msk.f32.vlgmr.msra.gmra.mrb[14].mxu1 %vm1962_vm4, %v2752_v55 }
 0x908   : > { %4424 = vmatpush3.bf16.msra.mxu1 %v4423_v54  ;;  %4284 = vmatprep.mubr.msk.f32.mxu1 %vm4693_vm0, %v4694_v11 }
 0x909   : > { %4425 = vmatprep.subr.bf16.mxu1 %v4692_v3 }
 0x90c   : > { %4427 = vmatpush3.bf16.msra.mxu1 %v4426_v58 }
 0x90d   : > { %4437 = vmatprep.subr.bf16.mxu1 %v4692_v3 }
 0x90f   : > { %4285 = vmatmul.mubr.msk.f32.vlgmr.msra.gmra.mrb[16].mxu1 %vm1476_vm1, %v2857_v59 }
 0x910   : > { %4313 = vmatprep.mubr.msk.f32.mxu1 %vm4693_vm0, %v4694_v11 }
 0x9da   : > { %v2830_v60 = vpop.f32.mrb[14].mxu1 }
 0x9db   : > { %v4275_v61 = vpop.f32.mrb[15].mxu1  ;;  %v2831_v4 = vadd.f32 %v3983_v63, %v2830_v60 }
 0x9dd   : > { %v2834_v6 = vsel %vm1476_vm1, %v2831_v4, 0.0 }
 0x9e2   : > { %v2941_v0 = vpop.f32.mrb[16].mxu1 }
 0x9e3   : > { %v2942_v1 = vadd.f32 %v3988_v62, %v2941_v0  ;;  %v4286_v2 = vpop.f32.mrb[17].mxu1 }
 0x9e4   : > { %v3083_v2 = vld [vmem:[%s5383_s2] sm:$0xff] }
 0x9e5   : > { %v2946_v5 = vsel %vm2945_vm6, %v2942_v1, 0.0 }
 0x9e6   : > { %2947 = vadd.xlane.f32.xlu0 %v2946_v5 }
 0x9ea   : > { %2835 = vadd.xlane.f32.xlu0 %v2834_v6  ;;  %v3085_v6 = vld [vmem:[%s5383_s2 + $0x10] sm:$0xff] }
 0xa73   : > { %v2948_v7 = vpop.xlane.xlu0 %2947 }
 0xa74   : > { %v2950_v8 = vmul.f32 0.0625, %v2948_v7  ;;  %v3086_v7 = vld [vmem:[%s5383_s2 + $0x18] sm:$0xff] }
 0xa76   : > { %v2951_v9 = vsub.f32 %v2942_v1, %v2950_v8  ;;  %v4441_v8 = vpack.c.bf16 %v3086_v7, %v3085_v6 }
 0xa77   : > { %v2836_v12 = vpop.xlane.xlu0 %2835 }
 0xa78   : > { %v2837_v13 = vmul.f32 0.03125, %v2836_v12  ;;  %v2952_v14 = vmul.f32 %v2951_v9, %v2951_v9 }
 0xa7a   : > { %v2838_v16 = vsub.f32 %v2831_v4, %v2837_v13  ;;  %v2953_v17 = vsel %vm2945_vm6, %v2952_v14, 0.0  ;;  %v3084_v4 = vld [vmem:[%s5383_s2 + $0x8] sm:$0xff] }
 0xa7b   : > { %2954 = vadd.xlane.f32.xlu1 %v2953_v17  ;;  %v4438_v5 = vpack.c.bf16 %v3084_v4, %v3083_v2  ;;  %v4008_v2 = vld [vmem:[%s5385_s4 + $0x1] ss:$0 sm:$0xff] }
 0xa7c   : > { %v2839_v19 = vmul.f32 %v2838_v16, %v2838_v16 }
 0xa7d   : > { %4439 = vmatpush3.bf16.msra.mxu1 %v4438_v5  ;;  %v4009_v5 = vld [vmem:[%s5385_s4 + $0x2] ss:$0 sm:$0xff] }
 0xa7e   : > { %v2840_v20 = vsel %vm1476_vm1, %v2839_v19, 0.0  ;;  %4440 = vmatprep.subr.bf16.mxu1 %v4692_v3  ;;  %v3967_v19 = vld [vmem:[%s5381_s6 + $0x1] ss:$0 sm:$0xff] }
 0xa7f   : > { %2455 = vadd.xlane.f32.xlu1 %v2454_v18 }
 0xa81   : > { %4442 = vmatpush3.bf16.msra.mxu1 %v4441_v8 }
 0xa82   : > { %4327 = vmatprep.subr.mxu1 %v4694_v11 }
 0xa83   : > { %2841 = vadd.xlane.f32.xlu1 %v2840_v20 }
 0xb08   : > { %v2955_v21 = vpop.xlane.xlu1 %2954 }
 0xb09   : > { %v2956_v25 = vmul.f32 0.0625, %v2955_v21  ;;  %v4002_v21 = vld [vmem:[%s5383_s2 + $0x40] sm:$0xff] }
 0xb0b   : > { %v2957_v26 = vadd.f32 1e-05, %v2956_v25  ;;  %v4003_v25 = vld [vmem:[%s5383_s2 + $0x48] sm:$0xff] }
 0xb0c   : > { %v2456_v27 = vpop.xlane.xlu1 %2455 }
 0xb0d   : > { %4559 = vrsqrt.f32 %v2957_v26  ;;  %v2457_v55 = vmul.f32 0.03125, %v2456_v27  ;;  %v4444_v26 = vpack.c.bf16 %v4003_v25, %v4002_v21  ;;  %v4004_v27 = vld [vmem:[%s5383_s2 + $0x50] sm:$0xff] }
 0xb0f   : > { %v2458_v57 = vsub.f32 %v2451_v15, %v2457_v55 }
 0xb10   : > { %v2842_v28 = vpop.xlane.xlu1 %2841 }
 0xb11   : > { %v2843_v32 = vmul.f32 0.03125, %v2842_v28  ;;  %v2459_v62 = vmul.f32 %v2458_v57, %v2458_v57  ;;  %v4005_v28 = vld [vmem:[%s5383_s2 + $0x58] sm:$0xff]  ;;  %s5387_s2 = sld [smem:[#allocation28_spill]] }
 0xb13   : > { %v2844_v36 = vadd.f32 1e-05, %v2843_v32  ;;  %v2460_v63 = vsel %vm1476_vm1, %v2459_v62, 0.0 }
 0xb15   : > { %4561 = vrsqrt.f32 %v2844_v36 }
 0xb17   : > { %v4560_v30 = vpop.eup %4559 }
 0xb18   : > { %v2959_v33 = vmul.f32 %v4560_v30, %v2951_v9  ;;  %v4447_v30 = vpack.c.bf16 %v4005_v28, %v4004_v27 }
 0xb1a   : > { %v2964_v35 = vmul.f32 %v3990_v31, %v2959_v33 }
 0xb1c   : > { %v2969_v37 = vadd.f32 %v3991_v34, %v2964_v35  ;;  %v3994_v35 = vld [vmem:[%s5384_s3 + $0x1] ss:$0 sm:$0xff] }
 0xb1e   : > { %v2971_v38 = vmul.f32 0.70710677, %v2969_v37  ;;  %v2970_v43 = vmul.f32 0.5, %v2969_v37  ;;  %v3995_v37 = vld [vmem:[%s5384_s3 + $0x2] ss:$0 sm:$0xff]  ;;  %s5388_s3 = sld [smem:[#allocation29_spill]] }
 0xb1f   : > { %v4562_v39 = vpop.eup %4561 }
 0xb20   : > { %4563 = verf.f32 %v2971_v38  ;;  %v2846_v46 = vmul.f32 %v4562_v39, %v2838_v16 }
 0xb22   : > { %v2851_v52 = vmul.f32 %v3986_v50, %v2846_v46 }
 0xb24   : > { %v2856_v54 = vadd.f32 %v3987_v53, %v2851_v52  ;;  %v3945_v52 = vld [vmem:[%s5386_s5] ss:$0 sm:$0xff] }
 0xb2a   : > { %v4564_v42 = vpop.eup %4563 }
 0xb2b   : > { %v2973_v44 = vadd.f32 1.0, %v4564_v42 }
 0xb2d   : > { %v2974_v47 = vmul.f32 %v2973_v44, %v2970_v43  ;;  %v4007_v44 = vld [vmem:[%s5385_s4] ss:$0 sm:$0xff]  ;;  %s3454_s4 = sld [smem:[#allocation2]] }
 0xb2f   : > { %4292 = vmatmul.mubr.msk.f32.vlgmr.msra.gmra.mrb[14].mxu0 %vm2945_vm6, %v2974_v47 }
 0xb30   : > { %4433 = vmatpush3.bf16.msra.mxu0 %v4432_v45  ;;  %4302 = vmatprep.mubr.msk.f32.mxu0 %vm4693_vm0, %v4694_v11 }
 0xb31   : > { %4434 = vmatprep.subr.bf16.mxu0 %v4692_v3 }
 0xb33   : > { %s3455_s6 = ssub.f32 0.0, %s3454_s4 }
 0xb34   : > { %4436 = vmatpush3.bf16.msra.mxu0 %v4435_v51 }
 0xb35   : > { %4443 = vmatprep.subr.bf16.mxu0 %v4692_v3 }
 0xb37   : > { %4303 = vmatmul.mubr.msk.f32.vlgmr.msra.gmra.mrb[16].mxu0 %vm1476_vm1, %v2856_v54  ;;  %v2071_v54 = vadd.f32 %v3945_v52, %v5089_v29 }
 0xb38   : > { %4324 = vmatprep.mubr.msk.f32.mxu0 %vm4693_vm0, %v4694_v11  ;;  %4445 = vmatpush3.bf16.msra.mxu0 %v4444_v26 }
 0xb39   : > { %4446 = vmatprep.subr.bf16.mxu0 %v4692_v3 }
 0xb3c   : > { %4448 = vmatpush3.bf16.msra.mxu0 %v4447_v30  ;;  %v3456_v30 = vstv %s3455_s6  ;;  %s1345_s6 = sand.u32 1, %s4641_s7  }
 0xb3d   : > { %4455 = vmatprep.subr.bf16.mxu0 %v4692_v3  ;;  %s3908_s4 = sshll.u32 %s1345_s6, 3  ;;  %s3683_s9 = scalar_lea.sflag [#allocation4], %s1345_s6 }
 0xc02   : > { %v3050_v58 = vpop.f32.mrb[14].mxu0 }
 0xc03   : > { %v3051_v59 = vadd.f32 %v3992_v56, %v3050_v58  ;;  %v4293_v60 = vpop.f32.mrb[15].mxu0  ;;  %v2074_v56 = vsel %vm1476_vm1, %v2071_v54, 0.0 }
 0xc05   : > { %v3054_v61 = vsel %vm1476_vm1, %v3051_v59, 0.0 }
 0xc06   : > { %3055 = vadd.xlane.f32.xlu0 %v3054_v61 }
 0xc0a   : > { %v3161_v0 = vpop.f32.mrb[16].mxu0  ;;  %2461 = vadd.xlane.f32.xlu0 %v2460_v63 }
 0xc0b   : > { %v4304_v1 = vpop.f32.mrb[17].mxu0 }
 0xc93   : > { %v3056_v9 = vpop.xlane.xlu0 %3055 }
 0xc94   : > { %v3057_v10 = vmul.f32 0.03125, %v3056_v9 }
 0xc96   : > { %v3058_v12 = vsub.f32 %v3051_v59, %v3057_v10 }
 0xc97   : > { %v2462_v13 = vpop.xlane.xlu0 %2461 }
 0xc98   : > { %v2463_v14 = vmul.f32 0.03125, %v2462_v13  ;;  %v3059_v15 = vmul.f32 %v3058_v12, %v3058_v12 }
 0xc9a   : > { %v2464_v16 = vadd.f32 1e-05, %v2463_v14  ;;  %v3060_v17 = vsel %vm1476_vm1, %v3059_v15, 0.0  ;;  %v4010_v14 = vld [vmem:[%s5388_s3] ss:$0 sm:$0xff] }
 0xc9b   : > { %3061 = vadd.xlane.f32.xlu1 %v3060_v17 }
 0xc9c   : > { %4565 = vrsqrt.f32 %v2464_v16 }
 0xca6   : > { %v4566_v18 = vpop.eup %4565 }
 0xca7   : > { %v2466_v20 = vmul.f32 %v4566_v18, %v2458_v57  ;;  %v3350_v57 = vld [vmem:[%s5387_s2] sm:$0x3f]  ;;  %s5389_s2 = sld [smem:[#allocation34_spill]] }
 0xca9   : > { %v2471_v23 = vmul.f32 %v3967_v19, %v2466_v20 }
 0xcab   : > { %v2476_v24 = vadd.f32 %v3968_v22, %v2471_v23 }
 0xcad   : > { %4314 = vmatmul.mubr.msk.f32.vlgmr.msra.gmra.mrb[18].mxu1 %vm1476_vm1, %v2476_v24  ;;  %v3470_v21 = vld [vmem:[%s5389_s2] sm:$0xff]  ;;  %v3471_v25 = vld [vmem:[%s5389_s2 + $0x8] sm:$0xff]  ;;  %v3473_v27 = vld [vmem:[%s5389_s2 + $0x18] sm:$0xff] }
 0xcae   : > { %4329 = vmatprep.mubr.msk.f32.mxu1 %vm4693_vm0, %v4694_v11  ;;  %4328 = vmatpush3.msk.msra.mxu1 %vm2000_vm5, %v3350_v57  ;;  %v4450_v26 = vpack.c.bf16 %v3471_v25, %v3470_v21 }
 0xcaf   : > { %4449 = vmatprep.subr.bf16.mxu1 %v4692_v3 }
 0xd28   : > { %v3062_v31 = vpop.xlane.xlu1 %3061 }
 0xd29   : > { %v3063_v32 = vmul.f32 0.03125, %v3062_v31  ;;  %v3457_v31 = vmul.f32 1.442695, %v3456_v30 }
 0xd2b   : > { %v3064_v33 = vadd.f32 1e-05, %v3063_v32 }
 0xd2d   : > { %4567 = vrsqrt.f32 %v3064_v33 }
 0xd37   : > { %v4568_v34 = vpop.eup %4567 }
 0xd38   : > { %v3066_v36 = vmul.f32 %v4568_v34, %v3058_v12 }
 0xd3a   : > { %v3071_v38 = vmul.f32 %v3994_v35, %v3066_v36 }
 0xd3c   : > { %v3076_v39 = vadd.f32 %v3995_v37, %v3071_v38 }
 0xd3e   : > { %4325 = vmatmul.mubr.msk.f32.vlgmr.msra.gmra.mrb[18].mxu0 %vm1476_vm1, %v3076_v39 }
 0xd3f   : > { %4347 = vmatprep.mubr.msk.f32.mxu0 %vm4693_vm0, %v4694_v11 }
 0xd80   : > { %v3234_v40 = vpop.f32.mrb[18].mxu1 }
 0xd81   : > { %v3235_v41 = vadd.f32 %v3234_v40, %v3161_v0  ;;  %v4315_v42 = vpop.f32.mrb[19].mxu1 }
 0xd82   : > { %v3948_v42 = vld [vmem:[%s5386_s5 + $0x1] ss:$0 sm:$0xff] }
 0xe11   : > { %v3312_v43 = vpop.f32.mrb[18].mxu0 }
 0xe12   : > { %v3316_v45 = vadd.f32 %v3312_v43, %v3235_v41  ;;  %v4326_v46 = vpop.f32.mrb[19].mxu0  ;;  %v4013_v43 = vld [vmem:[%s5388_s3 + $0x1] ss:$0 sm:$0xff] }
 0xe14   : > { %v3321_v47 = vadd.f32 %v4007_v44, %v3316_v45  ;;  %v4014_v45 = vld [vmem:[%s5388_s3 + $0x2] ss:$0 sm:$0xff]  ;;  %s1347_s3 = scalar_lea.vmem [#allocation3], %s3908_s4 }
 0xe16   : > { %v3322_v48 = vsel %vm1962_vm4, %v3321_v47, 0.0 }
 0xe17   : > { %3323 = vadd.xlane.f32.xlu0 %v3322_v48 }
 0xea4   : > { %v3324_v49 = vpop.xlane.xlu0 %3323 }
 0xea5   : > { %v3325_v50 = vmul.f32 0.16666667, %v3324_v49  ;;  %v3949_v49 = vld [vmem:[%s5386_s5 + $0x2] ss:$0 sm:$0xff]  ;;  %s3696_s5 = sshll.u32 %s1347_s3, 4  ;;  %s5259_s5 = int_to_ptr.vmem [resolvable:$true] %s3696_s5 }
 0xea6   : > { %s4587_s12 = scalar_lea.vmem %s5259_s5, 128 }
 0xea7   : > { %v3326_v51 = vsub.f32 %v3321_v47, %v3325_v50  ;;  %p4588_p11 = scmp.ne.s32.totalorder %s5259_s5, %s4587_s12 }
 0xea9   : > { %v3327_v53 = vmul.f32 %v3326_v51, %v3326_v51  ;;  %p4589_p12 = pnand %p4588_p11, %p4950_p5 }
 0xeab   : > { %v3328_v55 = vsel %vm1962_vm4, %v3327_v53, 0.0  ;;  %p4590_p13 = pneg %p4589_p12 }
 0xeac   : > { %3329 = vadd.xlane.f32.xlu1 %v3328_v55 }
 0xeb0   : > { %2075 = vadd.xlane.f32.xlu1 %v2074_v56 }
 0xf39   : > { %v3330_v58 = vpop.xlane.xlu1 %3329 }
 0xf3a   : > { %v3331_v59 = vmul.f32 0.16666667, %v3330_v58 }
 0xf3c   : > { %v3332_v60 = vadd.f32 1e-05, %v3331_v59 }
 0xf3d   : > { %v2076_v61 = vpop.xlane.xlu1 %2075 }
 0xf3e   : > { %4569 = vrsqrt.f32 %v3332_v60  ;;  %v2077_v62 = vmul.f32 0.03125, %v2076_v61 }
 0xf40   : > { %v2078_v29 = vsub.f32 %v2071_v54, %v2077_v62  ;;  %v4015_v54 = vld [vmem:[%s4894_s21] ss:$0 sm:$0xff] }
 0xf42   : > { %v2079_v63 = vmul.f32 %v2078_v29, %v2078_v29 }
 0xf44   : > { %v2080_v0 = vsel %vm1476_vm1, %v2079_v63, 0.0  ;;  %v3579_v63 = vld [vmem:[%s4899_s23] sm:$0xff] }
 0xf45   : > { %2081 = vadd.xlane.f32.xlu1 %v2080_v0  ;;  %v3580_v0 = vld [vmem:[%s4899_s23 + $0x8] sm:$0xff] }
 0xf48   : > { %v4570_v1 = vpop.eup %4569 }
 0xf49   : > { %v3334_v4 = vmul.f32 %v4570_v1, %v3326_v51  ;;  %v4456_v1 = vpack.c.bf16 %v3580_v0, %v3579_v63 }
 0xf4b   : > { %v3339_v6 = vmul.f32 %v4008_v2, %v3334_v4  ;;  %4457 = vmatpush3.bf16.msra.mxu0 %v4456_v1 }
 0xf4d   : > { %v3344_v7 = vadd.f32 %v4009_v5, %v3339_v6 }
 0xf4f   : > { %v3346_v8 = vmul.f32 0.70710677, %v3344_v7  ;;  %v3345_v10 = vmul.f32 0.5, %v3344_v7  ;;  %v4017_v7 = vld [vmem:[%s4894_s21 + $0x1] ss:$0 sm:$0xff] }
 0xf51   : > { %4571 = verf.f32 %v3346_v8 }
 0xf52   : > { %4573 = vpow2.f32 %v3457_v31 }
 0xf5b   : > { %v4572_v9 = vpop.eup %4571 }
 0xf5c   : > { %v3348_v12 = vadd.f32 1.0, %v4572_v9  ;;  %v4574_v37 = vpop.eup %4573  ;;  %v4018_v9 = vld [vmem:[%s4894_s21 + $0x2] ss:$0 sm:$0xff] }
 0xf5e   : > { %v3349_v13 = vmul.f32 %v3348_v12, %v3345_v10 }
 0xf60   : > { %4330 = vmatmul.mubr.msk.f32.vlgmr.msra.gmra.mrb[20].mxu1 %vm1962_vm4, %v3349_v13 }
 0xf61   : > { %4340 = vmatprep.mubr.msk.f32.mxu1 %vm4693_vm0, %v4694_v11  ;;  %v3472_v11 = vld [vmem:[%s5389_s2 + $0x10] sm:$0xff]  ;;  %4451 = vmatpush3.bf16.msra.mxu1 %v4450_v26  ;;  %s4024_s2 = sshll.u32 %s4933_s0, 7  ;;  %s4695_s0 = smov [#allocation3]  }
 0xf62   : > { %v4453_v28 = vpack.c.bf16 %v3473_v27, %v3472_v11  ;;  %4452 = vmatprep.subr.bf16.mxu1 %v4692_v3  ;;  %v3459_v3 = vadd.f32 1.0, %v4574_v37  ;;  %s5257_s8 = scalar_lea.hbm %s4909_s10, %s4024_s2  ;;  %s4591_s4 = sshll.u32 %s4695_s0, 4  ;;  %s4592_s4 = int_to_ptr.vmem [resolvable:$false] %s4591_s4 }
 0xf63   : > { %p4594_p0 = scmp.lt.s32.totalorder %s5259_s5, %s4592_s4 }
 0xf65   : > { %4454 = vmatpush3.bf16.msra.mxu1 %v4453_v28 }
 0xfd2   : > { %v2082_v32 = vpop.xlane.xlu1 %2081 }
 0xfd3   : > { %v2083_v33 = vmul.f32 0.03125, %v2082_v32  ;;  %v4021_v32 = vld [vmem:[%s5358_s1 + $0x1] ss:$0 sm:$0xff] }
 0xfd5   : > { %v2084_v34 = vadd.f32 1e-05, %v2083_v33 }
 0xfd7   : > { %4575 = vrsqrt.f32 %v2084_v34  ;;  %v4022_v34 = vld [vmem:[%s5358_s1 + $0x2] ss:$0 sm:$0xff] }
 0xfe1   : > { %v4576_v39 = vpop.eup %4575 }
 0xfe2   : > { %v2086_v40 = vmul.f32 %v4576_v39, %v2078_v29 }
 0xfe4   : > { %v2091_v46 = vmul.f32 %v3948_v42, %v2086_v40 }
 0xfe6   : > { %v2096_v51 = vadd.f32 %v3949_v49, %v2091_v46 }
0x1033   : > { %v3427_v15 = vpop.f32.mrb[20].mxu1 }
0x1034   : > { %v3428_v16 = vadd.f32 %v4010_v14, %v3427_v15  ;;  %v4331_v17 = vpop.f32.mrb[21].mxu1 }
0x1036   : > { %v3431_v18 = vsel %vm1476_vm1, %v3428_v16, 0.0 }
0x1037   : > { %3432 = vadd.xlane.f32.xlu0 %v3431_v18  ;;  %v4019_v18 = vld [vmem:[%s5358_s1] ss:$0 sm:$0xff]  ;;  %s4593_s1 = scalar_lea.vmem %s4592_s4, 256 }
0x1038   : > { %p4595_p1 = scmp.lt.s32.totalorder %s4593_s1, %s4587_s12 }
0x103a   : > { %p4596_p2 = por %p4595_p1, %p4594_p0 }
0x103c   : > { %p4597_p3 = pnand %p4596_p2, %p4590_p13 }
0x10c4   : > { %v3433_v19 = vpop.xlane.xlu0 %3432 }
0x10c5   : > { %v3434_v20 = vmul.f32 0.03125, %v3433_v19 }
0x10c7   : > { %v3435_v22 = vsub.f32 %v3428_v16, %v3434_v20 }
0x10c9   : > { %v3436_v23 = vmul.f32 %v3435_v22, %v3435_v22 }
0x10cb   : > { %v3437_v24 = vsel %vm1476_vm1, %v3436_v23, 0.0 }
0x10cc   : > { %3438 = vadd.xlane.f32.xlu0 %v3437_v24 }
0x1159   : > { %v3439_v35 = vpop.xlane.xlu0 %3438 }
0x115a   : > { %v3440_v36 = vmul.f32 0.03125, %v3439_v35 }
0x115c   : > { %v3441_v38 = vadd.f32 1e-05, %v3440_v36 }
0x115e   : > { %4577 = vrsqrt.f32 %v3441_v38 }
0x115f   : > { %4579 = vrcp.f32 %v3459_v3 }
0x1168   : > { %v4578_v41 = vpop.eup %4577 }
0x1169   : > { %v3443_v44 = vmul.f32 %v4578_v41, %v3435_v22  ;;  %v4580_v48 = vpop.eup %4579 }
0x116b   : > { %v3448_v47 = vmul.f32 %v4013_v43, %v3443_v44 }
0x116d   : > { %v3453_v50 = vadd.f32 %v4014_v45, %v3448_v47 }
0x116f   : > { %v3462_v52 = vmul.f32 %v4580_v48, %v3453_v50 }
0x1171   : > { %v3463_v53 = vsub.f32 %v2096_v51, %v3462_v52 }
0x1173   : > { %4341 = vmatmul.mubr.msk.f32.vlgmr.msra.gmra.mrb[22].mxu1 %vm1476_vm1, %v3463_v53 }
0x1246   : > { %v3547_v55 = vpop.f32.mrb[22].mxu1 }
0x1247   : > { %v3548_v56 = vadd.f32 %v4015_v54, %v3547_v55  ;;  %v4342_v57 = vpop.f32.mrb[23].mxu1 }
0x1249   : > { %v3551_v58 = vsel %vm2945_vm6, %v3548_v56, 0.0 }
0x124a   : > { %3552 = vadd.xlane.f32.xlu0 %v3551_v58 }
0x12d7   : > { %v3553_v59 = vpop.xlane.xlu0 %3552 }
0x12d8   : > { %v3554_v60 = vmul.f32 0.0625, %v3553_v59 }
0x12da   : > { %v3555_v61 = vsub.f32 %v3548_v56, %v3554_v60 }
0x12dc   : > { %v3556_v62 = vmul.f32 %v3555_v61, %v3555_v61 }
0x12de   : > { %v3557_v29 = vsel %vm2945_vm6, %v3556_v62, 0.0 }
0x12df   : > { %3558 = vadd.xlane.f32.xlu1 %v3557_v29 }
0x136c   : > { %v3559_v2 = vpop.xlane.xlu1 %3558 }
0x136d   : > { %v3560_v4 = vmul.f32 0.0625, %v3559_v2 }
0x136f   : > { %v3561_v5 = vadd.f32 1e-05, %v3560_v4 }
0x1371   : > { %4581 = vrsqrt.f32 %v3561_v5 }
0x137b   : > { %v4582_v6 = vpop.eup %4581 }
0x137c   : > { %v3563_v8 = vmul.f32 %v4582_v6, %v3555_v61 }
0x137e   : > { %v3568_v10 = vmul.f32 %v4017_v7, %v3563_v8 }
0x1380   : > { %v3573_v12 = vadd.f32 %v4018_v9, %v3568_v10 }
0x1382   : > { %v3575_v13 = vmul.f32 0.70710677, %v3573_v12  ;;  %v3574_v15 = vmul.f32 0.5, %v3573_v12 }
0x1384   : > { %4583 = verf.f32 %v3575_v13 }
0x138e   : > { %v4584_v14 = vpop.eup %4583 }
0x138f   : > { %v3577_v16 = vadd.f32 1.0, %v4584_v14 }
0x1391   : > { %v3578_v17 = vmul.f32 %v3577_v16, %v3574_v15 }
0x1393   : > { %4348 = vmatmul.mubr.msk.f32.vlgmr.msra.gmra.mrb[20].mxu0 %vm2945_vm6, %v3578_v17 }
0x1466   : > { %v3654_v19 = vpop.f32.mrb[20].mxu0 }
0x1467   : > { %v3655_v20 = vadd.f32 %v4019_v18, %v3654_v19  ;;  %v4349_v22 = vpop.f32.mrb[21].mxu0 }
0x1469   : > { %v3658_v23 = vsel %vm1476_vm1, %v3655_v20, 0.0 }
0x146a   : > { %3659 = vadd.xlane.f32.xlu0 %v3658_v23 }
0x14f7   : > { %v3660_v24 = vpop.xlane.xlu0 %3659 }
0x14f8   : > { %v3661_v21 = vmul.f32 0.03125, %v3660_v24 }
0x14fa   : > { %v3662_v25 = vsub.f32 %v3655_v20, %v3661_v21 }
0x14fc   : > { %v3663_v26 = vmul.f32 %v3662_v25, %v3662_v25 }
0x14fe   : > { %v3664_v11 = vsel %vm1476_vm1, %v3663_v26, 0.0 }
0x14ff   : > { %3665 = vadd.xlane.f32.xlu1 %v3664_v11 }
0x158c   : > { %v3666_v27 = vpop.xlane.xlu1 %3665 }
0x158d   : > { %v3667_v28 = vmul.f32 0.03125, %v3666_v27 }
0x158f   : > { %v3668_v30 = vadd.f32 1e-05, %v3667_v28 }
0x1591   : > { %4585 = vrsqrt.f32 %v3668_v30 }
0x159b   : > { %v4586_v31 = vpop.eup %4585 }
0x159c   : > { %v3670_v33 = vmul.f32 %v4586_v31, %v3662_v25 }
0x159e   : > { %v3675_v35 = vmul.f32 %v4021_v32, %v3670_v33 }
0x15a0   : > { %v3680_v36 = vadd.f32 %v4022_v34, %v3675_v35 }
0x15a2   : > { %3681 = vst.msk [vmem:[%s1347_s3] sm:$0xff] %vm1476_vm1, %v3680_v36 }
0x15a3   : > { %4600 = shalt.err (!%p4597_p3)
}
0x15a4   : > { %s4601_s3 = scalar_lea.hbm %s5257_s8, 128  ;;  %s4605_s2 = scalar_lea.hbm %s4909_s10, 256 }
0x15a5   : > { %p4602_p4 = scmp.ne.s32.totalorder %s5257_s8, %s4601_s3  ;;  %p4606_p9 = scmp.lt.u32.totalorder %s5257_s8, %s4909_s10 }
0x15a6   : > { %p4607_p10 = scmp.lt.u32.totalorder %s4605_s2, %s4601_s3  ;;  %p4609_p12 = scmp.lt.u32.totalorder %s4601_s3, %s5257_s8 }
0x15a7   : > { %p4603_p7 = pnand %p4602_p4, %p4950_p5 }
0x15a8   : > { %p4608_p11 = por %p4607_p10, %p4606_p9 }
0x15a9   : > { %p4604_p8 = pneg %p4603_p7 }
0x15aa   : > { %p4610_p0 = por %p4609_p12, %p4608_p11 }
0x15ac   : > { %p4611_p13 = pnand %p4610_p0, %p4604_p8 }
0x15ae   : > { %4614 = shalt.err (!%p4611_p13)
}
0x15af   : > { %4458 = dma.vmem_to_hbm [thread:$0]  (%p4950_p5), %s5259_s5, 128, %s5257_s8, %s3683_s9  }
0x15b0 PF: > { %p4464_p1 = scmp.ge.s32.totalorder %s4649_s25, 2  ;;  %s3708_s12 = sand.u32 1, %s4637_s16  }
0x15b1   : > { %s3709_s1 = scalar_lea.sflag [#allocation4], %s3708_s12 }
0x15b2   : > { %p4461_p2 = pnand %p4464_p1, %p4954_p6 }
0x15b4   : > { %4632 = dma.done.wait (!%p4461_p2), %s3709_s1, 128  }
0x15b5   : > { %4634 = vsyncadd (!%p4461_p2), %s3709_s1, 4294967168  ;;  %p94_p3 = scmp.ge.s32.totalorder %s4937_s15, 4   ;;  %s5390_s16 = smov %s4641_s7 }
0x15b6   : > { %s5391_s7 = smov %s4645_s11  ;;  %s5392_s11 = smov %s4948_s22 }
0x15b7   : > { %s5393_s25 = smov %s4937_s15  ;;  %96 = sbr.rel (!%p94_p3) target bundleno = 80 (0x50), region = 295 }
0x15be   :  { %3714 = vsyncpa [#allocation4], 1 }
0x15bf   :  { %3716 = vsyncpa [#allocation4 + $0x1], 1 }

</bundles_post_ra>
